<compile_context>
chip_gen: v6e
topology: v6e:2x2x1
jax: 0.10.0
libtpu: 0.0.40
codegen_flags: <defaults>
</compile_context>

<pallas_src>
import functools

import jax
import jax.numpy as jnp
from jax.experimental import pallas as pl
from jax.experimental.pallas import tpu as pltpu


def _round_up(n, m):
    return (n + m - 1) // m * m


MAX_TB = 512            # max batch rows per grid step (HBM-roofline sweet spot)


def _pick_tiling(batch):
    """Pad batch to a multiple of 16 and pick a tile that divides it (<=512)."""
    b_pad = _round_up(batch, 16)
    if b_pad <= MAX_TB:
        return b_pad, b_pad
    tb = 16
    for cand in range(MAX_TB, 15, -16):
        if b_pad % cand == 0:
            tb = cand
            break
    return b_pad, tb


# ----------------------------------------------------------------------------
# Fused Pallas kernel: encoder -> reparameterize -> decoder
# ----------------------------------------------------------------------------
def _vae_fused_kernel(switch_ref,                      # SMEM: [switch, 1 - switch]
                      x_ref, eps_ref,                  # (TB, flat), (TB, latent)
                      ew1_ref, eb1_ref,                # encoder hidden layer
                      ewmu_ref, ebmu_ref,              # encoder mu head
                      ewvar_ref, ebvar_ref,            # encoder var head
                      dw1_ref, db1_ref,                # decoder hidden layer
                      dwmu_ref, dbmu_ref,              # decoder mu head
                      dwvar_ref, dbvar_ref,            # decoder var head
                      zlat_ref,                        # (TB, lat_pad)  [z_mu|z_var|z|0]
                      xmu_ref, xvar_ref,               # (TB, flat) bf16 outputs
                      *, latent_dim, lat_pad):
    # ----- encoder -----
    x_bf = x_ref[...].astype(jnp.bfloat16)
    h = jnp.dot(x_bf, ew1_ref[...], preferred_element_type=jnp.float32)
    h = jnp.maximum(h + eb1_ref[...], 0.0)
    h_bf = h.astype(jnp.bfloat16)

    z_mu = (jnp.dot(h_bf, ewmu_ref[...], preferred_element_type=jnp.float32)
            + ebmu_ref[...])
    z_var = jax.nn.softplus(
        jnp.dot(h_bf, ewvar_ref[...], preferred_element_type=jnp.float32)
        + ebvar_ref[...])

    # ----- reparameterize (eq_samples = iw_samples = 1) -----
    z = z_mu + jnp.sqrt(z_var) * eps_ref[...]

    # Lane-dense latent output slab: [z_mu | z_var | z | zero-pad] -> one
    # unmasked 128-lane-wide store / single output DMA stream.
    pieces = [z_mu, z_var, z]
    pad_cols = lat_pad - 3 * latent_dim
    if pad_cols:
        pieces.append(jnp.zeros((z_mu.shape[0], pad_cols), jnp.float32))
    zlat_ref[...] = jnp.concatenate(pieces, axis=-1)

    # ----- decoder -----
    hd = jnp.dot(z.astype(jnp.bfloat16), dw1_ref[...],
                 preferred_element_type=jnp.float32)
    hd = jnp.maximum(hd + db1_ref[...], 0.0)
    hd_bf = hd.astype(jnp.bfloat16)

    # Two lane-dense (TB, flat) matmuls written straight to their outputs
    # (no 2*flat-wide f32 intermediate, no post-matmul slices).
    x_mu = jax.nn.sigmoid(
        jnp.dot(hd_bf, dwmu_ref[...], preferred_element_type=jnp.float32)
        + dbmu_ref[...])
    x_var = jax.nn.softplus(
        jnp.dot(hd_bf, dwvar_ref[...], preferred_element_type=jnp.float32)
        + dbvar_ref[...])

    s = switch_ref[0]
    one_minus_s = switch_ref[1]
    xmu_ref[...] = x_mu.astype(xmu_ref.dtype)
    xvar_ref[...] = (s * x_var + one_minus_s).astype(xvar_ref.dtype)


# ----------------------------------------------------------------------------
# Wrapper
# ----------------------------------------------------------------------------
def _vae_pallas(x_flat, eps, params, switch):
    B, flat_dim = x_flat.shape
    latent_dim = eps.shape[-1]
    hidden_dim = params["enc_b1"].shape[-1]

    b_pad, tb = _pick_tiling(B)
    grid = (b_pad // tb,)
    lat_pad = _round_up(3 * latent_dim, 128)

    if b_pad != B:
        pad = ((0, b_pad - B), (0, 0))
        x_flat = jnp.pad(x_flat, pad)
        eps = jnp.pad(eps, pad)

    switch_f = jnp.asarray(switch, jnp.float32)
    switch_smem = jnp.stack([switch_f, 1.0 - switch_f])          # shape (2,)

    # Weights/biases: full-array VMEM residents (constant block index =>
    # copied once, not re-DMA'd every grid step).
    vmem = pl.BlockSpec(memory_space=pltpu.MemorySpace.VMEM)
    smem = pl.BlockSpec(memory_space=pltpu.MemorySpace.SMEM)

    def row_block(cols):
        return pl.BlockSpec((tb, cols), lambda i: (i, 0))

    in_specs = [
        smem,                      # [switch, 1-switch]
        row_block(flat_dim),       # x
        row_block(latent_dim),     # eps
        vmem, vmem,                # enc_w1, enc_b1
        vmem, vmem,                # enc_wmu, enc_bmu
        vmem, vmem,                # enc_wvar, enc_bvar
        vmem, vmem,                # dec_w1, dec_b1
        vmem, vmem,                # dec_wmu, dec_bmu
        vmem, vmem,                # dec_wvar, dec_bvar
    ]
    out_specs = (
        row_block(lat_pad),        # [z_mu | z_var | z | pad]
        row_block(flat_dim),       # x_mu  (bf16)
        row_block(flat_dim),       # x_var (bf16)
    )
    out_shape = (
        jax.ShapeDtypeStruct((b_pad, lat_pad), jnp.float32),
        jax.ShapeDtypeStruct((b_pad, flat_dim), jnp.bfloat16),
        jax.ShapeDtypeStruct((b_pad, flat_dim), jnp.bfloat16),
    )

    flops = 2 * b_pad * (flat_dim * hidden_dim           # encoder hidden
                         + 2 * hidden_dim * latent_dim   # encoder mu/var heads
                         + latent_dim * hidden_dim       # decoder hidden
                         + 2 * hidden_dim * flat_dim)    # decoder mu/var heads
    transcendentals = b_pad * (3 * latent_dim + 3 * flat_dim)
    param_bytes = sum(int(v.size) * v.dtype.itemsize for v in params.values())
    io_bytes = (4 * (int(x_flat.size) + int(eps.size) + b_pad * lat_pad)
                + 2 * (2 * b_pad * flat_dim) + 8)
    cost = pl.CostEstimate(flops=flops, transcendentals=transcendentals,
                           bytes_accessed=param_bytes + io_bytes)

    cp_kwargs = dict(dimension_semantics=("parallel",))
    if tb >= 256:
        # Large tiles exceed v5e's 16 MiB default scoped-VMEM limit; stay well
        # under v7x's 64 MiB physical VMEM per TensorCore.
        cp_kwargs["vmem_limit_bytes"] = 40 * 1024 * 1024

    kernel = functools.partial(_vae_fused_kernel,
                               latent_dim=latent_dim, lat_pad=lat_pad)

    zlat, x_mu, x_var = pl.pallas_call(
        kernel,
        grid=grid,
        in_specs=in_specs,
        out_specs=out_specs,
        out_shape=out_shape,
        compiler_params=pltpu.CompilerParams(**cp_kwargs),
        cost_estimate=cost,
    )(switch_smem, x_flat, eps,
      params["enc_w1"], params["enc_b1"],
      params["enc_wmu"], params["enc_bmu"],
      params["enc_wvar"], params["enc_bvar"],
      params["dec_w1"], params["dec_b1"],
      params["dec_wmu"], params["dec_bmu"],
      params["dec_wvar"], params["dec_bvar"])

    # drop batch padding, split the packed latent slab
    z_mu = zlat[:B, :latent_dim]
    z_var = zlat[:B, latent_dim:2 * latent_dim]
    z = zlat[:B, 2 * latent_dim:3 * latent_dim]
    return z_mu, z_var, z, x_mu[:B], x_var[:B]


@functools.partial(jax.jit, static_argnames=("input_shape",))
def vae_forward(x, eps, params, input_shape, switch=1.0):
    """Full VAE forward: returns (x_mu, x_var, [z], [z_mu], [z_var]).

    x_mu / x_var are bfloat16 (bandwidth optimization); latents stay float32.
    """
    B = x.shape[0]
    x_flat = x.reshape(B, -1)                       # x.view(B, -1)
    z_mu, z_var, z, x_mu, x_var = _vae_pallas(x_flat, eps, params, switch)
    x_mu = x_mu.reshape((B,) + input_shape)         # back to NCHW
    x_var = x_var.reshape((B,) + input_shape)
    return x_mu, x_var, [z], [z_mu], [z_var]


# ----------------------------------------------------------------------------
# Pure-JAX reference (same bf16 weights / f32 accumulation) for validation
# ----------------------------------------------------------------------------
def vae_reference(x, eps, params, input_shape, switch=1.0):
    B = x.shape[0]
    x_flat = x.reshape(B, -1)

    def mm(a, w):
        return jnp.dot(a.astype(jnp.bfloat16), w,
                       preferred_element_type=jnp.float32)

    h = jnp.maximum(mm(x_flat, params["enc_w1"]) + params["enc_b1"], 0.0)
    z_mu = mm(h, params["enc_wmu"]) + params["enc_bmu"]
    z_var = jax.nn.softplus(mm(h, params["enc_wvar"]) + params["enc_bvar"])
    z = z_mu + jnp.sqrt(z_var) * eps
    hd = jnp.maximum(mm(z, params["dec_w1"]) + params["dec_b1"], 0.0)
    x_mu = jax.nn.sigmoid(mm(hd, params["dec_wmu"]) + params["dec_bmu"])
    x_var = (switch * jax.nn.softplus(mm(hd, params["dec_wvar"]) + params["dec_bvar"])
             + (1.0 - switch))
    return (x_mu.reshape((B,) + input_shape),
            x_var.reshape((B,) + input_shape), z, z_mu, z_var)


# ----------------------------------------------------------------------------
# Deterministic parameter init (weights in bf16, biases in f32)
# ----------------------------------------------------------------------------
def init_params(key, flat_dim, hidden_dim, latent_dim):
    ks = jax.random.split(key, 6)
    s = 0.02

    def w(k, shape):
        return (s * jax.random.normal(k, shape, jnp.float32)).astype(jnp.bfloat16)

    return {
        "enc_w1":   w(ks[0], (flat_dim, hidden_dim)),
        "enc_b1":   jnp.zeros((1, hidden_dim), jnp.float32),
        "enc_wmu":  w(ks[1], (hidden_dim, latent_dim)),
        "enc_bmu":  jnp.zeros((1, latent_dim), jnp.float32),
        "enc_wvar": w(ks[2], (hidden_dim, latent_dim)),
        "enc_bvar": jnp.zeros((1, latent_dim), jnp.float32),
        "dec_w1":   w(ks[3], (latent_dim, hidden_dim)),
        "dec_b1":   jnp.zeros((1, hidden_dim), jnp.float32),
        "dec_wmu":  w(ks[4], (hidden_dim, flat_dim)),
        "dec_bmu":  jnp.zeros((1, flat_dim), jnp.float32),
        "dec_wvar": w(ks[5], (hidden_dim, flat_dim)),
        "dec_bvar": jnp.zeros((1, flat_dim), jnp.float32),
    }


# ----------------------------------------------------------------------------
# Main
# ----------------------------------------------------------------------------
if __name__ == "__main__":
    key = jax.random.PRNGKey(0)
    k_x, k_eps, k_p = jax.random.split(key, 3)

    input_shape = (4, 16, 16)          # (C, H, W)
    batch = 2
    flat_dim = 4 * 16 * 16             # 1024
    hidden_dim = 128
    latent_dim = 32

    params = init_params(k_p, flat_dim, hidden_dim, latent_dim)

    x = jax.random.normal(k_x, (batch,) + input_shape, jnp.float32)     # NCHW
    # eps for reparameterize (eq_samples = iw_samples = 1)
    eps = jax.random.normal(k_eps, (batch, latent_dim), jnp.float32)

    x_mu, x_var, zs, z_mus, z_vars = vae_forward(
        x, eps, params, input_shape=input_shape, switch=1.0)
    jax.block_until_ready((x_mu, x_var, zs[0], z_mus[0], z_vars[0]))

    assert x_mu.shape == (batch,) + input_shape
    assert x_var.shape == (batch,) + input_shape
    assert zs[0].shape == (batch, latent_dim)
    assert z_mus[0].shape == (batch, latent_dim)
    assert z_vars[0].shape == (batch, latent_dim)

    # numerical check against a pure-JAX reference using the same bf16 weights
    r_xmu, r_xvar, r_z, r_zmu, r_zvar = vae_reference(
        x, eps, params, input_shape, switch=1.0)
    for got, ref in ((x_mu, r_xmu), (x_var, r_xvar), (zs[0], r_z),
                     (z_mus[0], r_zmu), (z_vars[0], r_zvar)):
        got32 = jnp.asarray(got, jnp.float32)
        ref32 = jnp.asarray(ref, jnp.float32)
        assert jnp.allclose(got32, ref32, atol=5e-2, rtol=5e-2), \
            float(jnp.max(jnp.abs(got32 - ref32)))

    print("KERNEL_OK")
</pallas_src>

<mosaic_0001>
module attributes {stable_mosaic.version = 11 : i64} {
  func.func @_vae_fused_kernel(%arg0: i32, %arg1: memref<2xf32, #tpu.memory_space<smem>>, %arg2: memref<16x1024xf32, #tpu.memory_space<vmem>>, %arg3: memref<16x32xf32, #tpu.memory_space<vmem>>, %arg4: memref<1024x128xbf16, #tpu.memory_space<vmem>>, %arg5: memref<1x128xf32, #tpu.memory_space<vmem>>, %arg6: memref<128x32xbf16, #tpu.memory_space<vmem>>, %arg7: memref<1x32xf32, #tpu.memory_space<vmem>>, %arg8: memref<128x32xbf16, #tpu.memory_space<vmem>>, %arg9: memref<1x32xf32, #tpu.memory_space<vmem>>, %arg10: memref<32x128xbf16, #tpu.memory_space<vmem>>, %arg11: memref<1x128xf32, #tpu.memory_space<vmem>>, %arg12: memref<128x1024xbf16, #tpu.memory_space<vmem>>, %arg13: memref<1x1024xf32, #tpu.memory_space<vmem>>, %arg14: memref<128x1024xbf16, #tpu.memory_space<vmem>>, %arg15: memref<1x1024xf32, #tpu.memory_space<vmem>>, %arg16: memref<16x128xf32, #tpu.memory_space<vmem>>, %arg17: memref<16x1024xbf16, #tpu.memory_space<vmem>>, %arg18: memref<16x1024xbf16, #tpu.memory_space<vmem>>) attributes {dimension_semantics = [#tpu.dimension_semantics<parallel>], iteration_bounds = array<i64: 1>, scalar_prefetch = 0 : i64, scratch_operands = 0 : i64, tpu.core_type = #tpu.core_type<tc>, window_params = [{transform_indices = @transform_0, window_bounds = array<i64: 2>}, {transform_indices = @transform_1, window_bounds = array<i64: 16, 1024>}, {transform_indices = @transform_2, window_bounds = array<i64: 16, 32>}, {pipeline_mode = #tpu.pipeline_mode<synchronous>, transform_indices = @transform_3, window_bounds = array<i64: 1024, 128>}, {pipeline_mode = #tpu.pipeline_mode<synchronous>, transform_indices = @transform_4, window_bounds = array<i64: 1, 128>}, {pipeline_mode = #tpu.pipeline_mode<synchronous>, transform_indices = @transform_5, window_bounds = array<i64: 128, 32>}, {pipeline_mode = #tpu.pipeline_mode<synchronous>, transform_indices = @transform_6, window_bounds = array<i64: 1, 32>}, {pipeline_mode = #tpu.pipeline_mode<synchronous>, transform_indices = @transform_7, window_bounds = array<i64: 128, 32>}, {pipeline_mode = #tpu.pipeline_mode<synchronous>, transform_indices = @transform_8, window_bounds = array<i64: 1, 32>}, {pipeline_mode = #tpu.pipeline_mode<synchronous>, transform_indices = @transform_9, window_bounds = array<i64: 32, 128>}, {pipeline_mode = #tpu.pipeline_mode<synchronous>, transform_indices = @transform_10, window_bounds = array<i64: 1, 128>}, {pipeline_mode = #tpu.pipeline_mode<synchronous>, transform_indices = @transform_11, window_bounds = array<i64: 128, 1024>}, {pipeline_mode = #tpu.pipeline_mode<synchronous>, transform_indices = @transform_12, window_bounds = array<i64: 1, 1024>}, {pipeline_mode = #tpu.pipeline_mode<synchronous>, transform_indices = @transform_13, window_bounds = array<i64: 128, 1024>}, {pipeline_mode = #tpu.pipeline_mode<synchronous>, transform_indices = @transform_14, window_bounds = array<i64: 1, 1024>}, {transform_indices = @transform_15, window_bounds = array<i64: 16, 128>}, {transform_indices = @transform_16, window_bounds = array<i64: 16, 1024>}, {transform_indices = @transform_17, window_bounds = array<i64: 16, 1024>}]} {
    %c0 = arith.constant 0 : index
    %c0_0 = arith.constant 0 : index
    %0 = vector.load %arg2[%c0, %c0_0] : memref<16x1024xf32, #tpu.memory_space<vmem>>, vector<16x1024xf32>
    %1 = arith.truncf %0 : vector<16x1024xf32> to vector<16x1024xbf16>
    %c0_1 = arith.constant 0 : index
    %c0_2 = arith.constant 0 : index
    %2 = vector.load %arg4[%c0_1, %c0_2] : memref<1024x128xbf16, #tpu.memory_space<vmem>>, vector<1024x128xbf16>
    %cst = arith.constant dense<0.000000e+00> : vector<16x128xf32>
    %3 = tpu.matmul %1, %2, %cst {dimension_numbers = #tpu.dot_dimension_numbers<[1], [0], [0], [1], [0, 0, 1, 1], [], []>} : vector<16x1024xbf16>, vector<1024x128xbf16>, vector<16x128xf32> -> vector<16x128xf32>
    %c0_3 = arith.constant 0 : index
    %c0_4 = arith.constant 0 : index
    %4 = vector.load %arg5[%c0_3, %c0_4] : memref<1x128xf32, #tpu.memory_space<vmem>>, vector<1x128xf32>
    %5 = vector.broadcast %4 : vector<1x128xf32> to vector<16x128xf32>
    %6 = arith.addf %3, %5 : vector<16x128xf32>
    %cst_5 = arith.constant 0.000000e+00 : f32
    %7 = vector.broadcast %cst_5 : f32 to vector<16x128xf32>
    %8 = arith.maximumf %6, %7 : vector<16x128xf32>
    %9 = arith.truncf %8 : vector<16x128xf32> to vector<16x128xbf16>
    %c0_6 = arith.constant 0 : index
    %c0_7 = arith.constant 0 : index
    %10 = vector.load %arg6[%c0_6, %c0_7] : memref<128x32xbf16, #tpu.memory_space<vmem>>, vector<128x32xbf16>
    %cst_8 = arith.constant dense<0.000000e+00> : vector<16x32xf32>
    %11 = tpu.matmul %9, %10, %cst_8 {dimension_numbers = #tpu.dot_dimension_numbers<[1], [0], [0], [1], [0, 0, 1, 1], [], []>} : vector<16x128xbf16>, vector<128x32xbf16>, vector<16x32xf32> -> vector<16x32xf32>
    %c0_9 = arith.constant 0 : index
    %c0_10 = arith.constant 0 : index
    %12 = vector.load %arg7[%c0_9, %c0_10] : memref<1x32xf32, #tpu.memory_space<vmem>>, vector<1x32xf32>
    %13 = vector.broadcast %12 : vector<1x32xf32> to vector<16x32xf32>
    %14 = arith.addf %11, %13 : vector<16x32xf32>
    %c0_11 = arith.constant 0 : index
    %c0_12 = arith.constant 0 : index
    %15 = vector.load %arg8[%c0_11, %c0_12] : memref<128x32xbf16, #tpu.memory_space<vmem>>, vector<128x32xbf16>
    %cst_13 = arith.constant dense<0.000000e+00> : vector<16x32xf32>
    %16 = tpu.matmul %9, %15, %cst_13 {dimension_numbers = #tpu.dot_dimension_numbers<[1], [0], [0], [1], [0, 0, 1, 1], [], []>} : vector<16x128xbf16>, vector<128x32xbf16>, vector<16x32xf32> -> vector<16x32xf32>
    %c0_14 = arith.constant 0 : index
    %c0_15 = arith.constant 0 : index
    %17 = vector.load %arg9[%c0_14, %c0_15] : memref<1x32xf32, #tpu.memory_space<vmem>>, vector<1x32xf32>
    %18 = vector.broadcast %17 : vector<1x32xf32> to vector<16x32xf32>
    %19 = arith.addf %16, %18 : vector<16x32xf32>
    %cst_16 = arith.constant 0.000000e+00 : f32
    %20 = vector.broadcast %cst_16 : f32 to vector<16x32xf32>
    %21 = arith.maximumf %19, %20 : vector<16x32xf32>
    %22 = vector.broadcast %cst_16 : f32 to vector<16x32xf32>
    %23 = arith.subf %19, %22 : vector<16x32xf32>
    %24 = arith.cmpf one, %23, %23 : vector<16x32xf32>
    %25 = vector.broadcast %cst_16 : f32 to vector<16x32xf32>
    %26 = arith.addf %19, %25 : vector<16x32xf32>
    %27 = math.absf %23 : vector<16x32xf32>
    %cst_17 = arith.constant 0.000000e+00 : f32
    %28 = vector.broadcast %cst_17 : f32 to vector<16x32xf32>
    %29 = arith.subf %28, %27 : vector<16x32xf32>
    %30 = math.exp %29 : vector<16x32xf32>
    %31 = math.log1p %30 : vector<16x32xf32>
    %32 = arith.addf %21, %31 : vector<16x32xf32>
    %33 = arith.select %24, %26, %32 : vector<16x32xi1>, vector<16x32xf32>
    %34 = math.sqrt %33 : vector<16x32xf32>
    %c0_18 = arith.constant 0 : index
    %c0_19 = arith.constant 0 : index
    %35 = vector.load %arg3[%c0_18, %c0_19] : memref<16x32xf32, #tpu.memory_space<vmem>>, vector<16x32xf32>
    %36 = arith.mulf %34, %35 : vector<16x32xf32>
    %37 = arith.addf %14, %36 : vector<16x32xf32>
    %cst_20 = arith.constant 0.000000e+00 : f32
    %38 = vector.broadcast %cst_20 : f32 to vector<16x32xf32>
    %39 = tpu.concatenate %14, %33, %37, %38 in 1 : vector<16x32xf32>, vector<16x32xf32>, vector<16x32xf32>, vector<16x32xf32> -> vector<16x128xf32>
    %c0_21 = arith.constant 0 : index
    %c0_22 = arith.constant 0 : index
    %40 = vector.load %arg16[%c0_21, %c0_22] : memref<16x128xf32, #tpu.memory_space<vmem>>, vector<16x128xf32>
    tpu.vector_store %arg16[%c0_21, %c0_22], %39 {strides = array<i32>} : memref<16x128xf32, #tpu.memory_space<vmem>>, vector<16x128xf32>,
    %41 = arith.truncf %37 : vector<16x32xf32> to vector<16x32xbf16>
    %c0_23 = arith.constant 0 : index
    %c0_24 = arith.constant 0 : index
    %42 = vector.load %arg10[%c0_23, %c0_24] : memref<32x128xbf16, #tpu.memory_space<vmem>>, vector<32x128xbf16>
    %cst_25 = arith.constant dense<0.000000e+00> : vector<16x128xf32>
    %43 = tpu.matmul %41, %42, %cst_25 {dimension_numbers = #tpu.dot_dimension_numbers<[1], [0], [0], [1], [0, 0, 1, 1], [], []>} : vector<16x32xbf16>, vector<32x128xbf16>, vector<16x128xf32> -> vector<16x128xf32>
    %c0_26 = arith.constant 0 : index
    %c0_27 = arith.constant 0 : index
    %44 = vector.load %arg11[%c0_26, %c0_27] : memref<1x128xf32, #tpu.memory_space<vmem>>, vector<1x128xf32>
    %45 = vector.broadcast %44 : vector<1x128xf32> to vector<16x128xf32>
    %46 = arith.addf %43, %45 : vector<16x128xf32>
    %cst_28 = arith.constant 0.000000e+00 : f32
    %47 = vector.broadcast %cst_28 : f32 to vector<16x128xf32>
    %48 = arith.maximumf %46, %47 : vector<16x128xf32>
    %49 = arith.truncf %48 : vector<16x128xf32> to vector<16x128xbf16>
    %c0_29 = arith.constant 0 : index
    %c0_30 = arith.constant 0 : index
    %50 = vector.load %arg12[%c0_29, %c0_30] : memref<128x1024xbf16, #tpu.memory_space<vmem>>, vector<128x1024xbf16>
    %cst_31 = arith.constant dense<0.000000e+00> : vector<16x1024xf32>
    %51 = tpu.matmul %49, %50, %cst_31 {dimension_numbers = #tpu.dot_dimension_numbers<[1], [0], [0], [1], [0, 0, 1, 1], [], []>} : vector<16x128xbf16>, vector<128x1024xbf16>, vector<16x1024xf32> -> vector<16x1024xf32>
    %c0_32 = arith.constant 0 : index
    %c0_33 = arith.constant 0 : index
    %52 = vector.load %arg13[%c0_32, %c0_33] : memref<1x1024xf32, #tpu.memory_space<vmem>>, vector<1x1024xf32>
    %53 = vector.broadcast %52 : vector<1x1024xf32> to vector<16x1024xf32>
    %54 = arith.addf %51, %53 : vector<16x1024xf32>
    %55 = arith.negf %54 : vector<16x1024xf32>
    %56 = math.exp %55 : vector<16x1024xf32>
    %cst_34 = arith.constant 1.000000e+00 : f32
    %57 = vector.broadcast %cst_34 : f32 to vector<16x1024xf32>
    %58 = arith.addf %57, %56 : vector<16x1024xf32>
    %59 = arith.divf %57, %58 : vector<16x1024xf32>
    %c0_35 = arith.constant 0 : index
    %c0_36 = arith.constant 0 : index
    %60 = vector.load %arg14[%c0_35, %c0_36] : memref<128x1024xbf16, #tpu.memory_space<vmem>>, vector<128x1024xbf16>
    %cst_37 = arith.constant dense<0.000000e+00> : vector<16x1024xf32>
    %61 = tpu.matmul %49, %60, %cst_37 {dimension_numbers = #tpu.dot_dimension_numbers<[1], [0], [0], [1], [0, 0, 1, 1], [], []>} : vector<16x128xbf16>, vector<128x1024xbf16>, vector<16x1024xf32> -> vector<16x1024xf32>
    %c0_38 = arith.constant 0 : index
    %c0_39 = arith.constant 0 : index
    %62 = vector.load %arg15[%c0_38, %c0_39] : memref<1x1024xf32, #tpu.memory_space<vmem>>, vector<1x1024xf32>
    %63 = vector.broadcast %62 : vector<1x1024xf32> to vector<16x1024xf32>
    %64 = arith.addf %61, %63 : vector<16x1024xf32>
    %cst_40 = arith.constant 0.000000e+00 : f32
    %65 = vector.broadcast %cst_40 : f32 to vector<16x1024xf32>
    %66 = arith.maximumf %64, %65 : vector<16x1024xf32>
    %67 = vector.broadcast %cst_40 : f32 to vector<16x1024xf32>
    %68 = arith.subf %64, %67 : vector<16x1024xf32>
    %69 = arith.cmpf one, %68, %68 : vector<16x1024xf32>
    %70 = vector.broadcast %cst_40 : f32 to vector<16x1024xf32>
    %71 = arith.addf %64, %70 : vector<16x1024xf32>
    %72 = math.absf %68 : vector<16x1024xf32>
    %cst_41 = arith.constant 0.000000e+00 : f32
    %73 = vector.broadcast %cst_41 : f32 to vector<16x1024xf32>
    %74 = arith.subf %73, %72 : vector<16x1024xf32>
    %75 = math.exp %74 : vector<16x1024xf32>
    %76 = math.log1p %75 : vector<16x1024xf32>
    %77 = arith.addf %66, %76 : vector<16x1024xf32>
    %78 = arith.select %69, %71, %77 : vector<16x1024xi1>, vector<16x1024xf32>
    %c0_42 = arith.constant 0 : index
    %79 = memref.load %arg1[%c0_42] : memref<2xf32, #tpu.memory_space<smem>>
    %c1 = arith.constant 1 : index
    %80 = memref.load %arg1[%c1] : memref<2xf32, #tpu.memory_space<smem>>
    %81 = arith.truncf %59 : vector<16x1024xf32> to vector<16x1024xbf16>
    %c0_43 = arith.constant 0 : index
    %c0_44 = arith.constant 0 : index
    %82 = vector.load %arg17[%c0_43, %c0_44] : memref<16x1024xbf16, #tpu.memory_space<vmem>>, vector<16x1024xbf16>
    tpu.vector_store %arg17[%c0_43, %c0_44], %81 {strides = array<i32>} : memref<16x1024xbf16, #tpu.memory_space<vmem>>, vector<16x1024xbf16>,
    %83 = vector.broadcast %79 : f32 to vector<16x1024xf32>
    %84 = arith.mulf %83, %78 : vector<16x1024xf32>
    %85 = vector.broadcast %80 : f32 to vector<16x1024xf32>
    %86 = arith.addf %84, %85 : vector<16x1024xf32>
    %87 = arith.truncf %86 : vector<16x1024xf32> to vector<16x1024xbf16>
    %c0_45 = arith.constant 0 : index
    %c0_46 = arith.constant 0 : index
    %88 = vector.load %arg18[%c0_45, %c0_46] : memref<16x1024xbf16, #tpu.memory_space<vmem>>, vector<16x1024xbf16>
    tpu.vector_store %arg18[%c0_45, %c0_46], %87 {strides = array<i32>} : memref<16x1024xbf16, #tpu.memory_space<vmem>>, vector<16x1024xbf16>,
    return
  }
  func.func @transform_0(%arg0: i32) -> i32 {
    %c0_i32 = arith.constant 0 : i32
    %c0_i32_0 = arith.constant 0 : i32
    return %c0_i32 : i32
  }
  func.func @transform_1(%arg0: i32) -> (i32, i32) {
    %c0_i32 = arith.constant 0 : i32
    %c0_i32_0 = arith.constant 0 : i32
    return %arg0, %c0_i32 : i32, i32
  }
  func.func @transform_2(%arg0: i32) -> (i32, i32) {
    %c0_i32 = arith.constant 0 : i32
    %c0_i32_0 = arith.constant 0 : i32
    return %arg0, %c0_i32 : i32, i32
  }
  func.func @transform_3(%arg0: i32) -> (i32, i32) {
    %c0_i32 = arith.constant 0 : i32
    %c0_i32_0 = arith.constant 0 : i32
    %c0_i32_1 = arith.constant 0 : i32
    return %c0_i32, %c0_i32_0 : i32, i32
  }
  func.func @transform_4(%arg0: i32) -> (i32, i32) {
    %c0_i32 = arith.constant 0 : i32
    %c0_i32_0 = arith.constant 0 : i32
    %c0_i32_1 = arith.constant 0 : i32
    return %c0_i32, %c0_i32_0 : i32, i32
  }
  func.func @transform_5(%arg0: i32) -> (i32, i32) {
    %c0_i32 = arith.constant 0 : i32
    %c0_i32_0 = arith.constant 0 : i32
    %c0_i32_1 = arith.constant 0 : i32
    return %c0_i32, %c0_i32_0 : i32, i32
  }
  func.func @transform_6(%arg0: i32) -> (i32, i32) {
    %c0_i32 = arith.constant 0 : i32
    %c0_i32_0 = arith.constant 0 : i32
    %c0_i32_1 = arith.constant 0 : i32
    return %c0_i32, %c0_i32_0 : i32, i32
  }
  func.func @transform_7(%arg0: i32) -> (i32, i32) {
    %c0_i32 = arith.constant 0 : i32
    %c0_i32_0 = arith.constant 0 : i32
    %c0_i32_1 = arith.constant 0 : i32
    return %c0_i32, %c0_i32_0 : i32, i32
  }
  func.func @transform_8(%arg0: i32) -> (i32, i32) {
    %c0_i32 = arith.constant 0 : i32
    %c0_i32_0 = arith.constant 0 : i32
    %c0_i32_1 = arith.constant 0 : i32
    return %c0_i32, %c0_i32_0 : i32, i32
  }
  func.func @transform_9(%arg0: i32) -> (i32, i32) {
    %c0_i32 = arith.constant 0 : i32
    %c0_i32_0 = arith.constant 0 : i32
    %c0_i32_1 = arith.constant 0 : i32
    return %c0_i32, %c0_i32_0 : i32, i32
  }
  func.func @transform_10(%arg0: i32) -> (i32, i32) {
    %c0_i32 = arith.constant 0 : i32
    %c0_i32_0 = arith.constant 0 : i32
    %c0_i32_1 = arith.constant 0 : i32
    return %c0_i32, %c0_i32_0 : i32, i32
  }
  func.func @transform_11(%arg0: i32) -> (i32, i32) {
    %c0_i32 = arith.constant 0 : i32
    %c0_i32_0 = arith.constant 0 : i32
    %c0_i32_1 = arith.constant 0 : i32
    return %c0_i32, %c0_i32_0 : i32, i32
  }
  func.func @transform_12(%arg0: i32) -> (i32, i32) {
    %c0_i32 = arith.constant 0 : i32
    %c0_i32_0 = arith.constant 0 : i32
    %c0_i32_1 = arith.constant 0 : i32
    return %c0_i32, %c0_i32_0 : i32, i32
  }
  func.func @transform_13(%arg0: i32) -> (i32, i32) {
    %c0_i32 = arith.constant 0 : i32
    %c0_i32_0 = arith.constant 0 : i32
    %c0_i32_1 = arith.constant 0 : i32
    return %c0_i32, %c0_i32_0 : i32, i32
  }
  func.func @transform_14(%arg0: i32) -> (i32, i32) {
    %c0_i32 = arith.constant 0 : i32
    %c0_i32_0 = arith.constant 0 : i32
    %c0_i32_1 = arith.constant 0 : i32
    return %c0_i32, %c0_i32_0 : i32, i32
  }
  func.func @transform_15(%arg0: i32) -> (i32, i32) {
    %c0_i32 = arith.constant 0 : i32
    %c0_i32_0 = arith.constant 0 : i32
    return %arg0, %c0_i32 : i32, i32
  }
  func.func @transform_16(%arg0: i32) -> (i32, i32) {
    %c0_i32 = arith.constant 0 : i32
    %c0_i32_0 = arith.constant 0 : i32
    return %arg0, %c0_i32 : i32, i32
  }
  func.func @transform_17(%arg0: i32) -> (i32, i32) {
    %c0_i32 = arith.constant 0 : i32
    %c0_i32_0 = arith.constant 0 : i32
    return %arg0, %c0_i32 : i32, i32
  }
}

</mosaic_0001>

<bundles_post_ra>
// kernel: vae_forward.1
= control target key start
LH: loop header
LB: loop body
LE: loop exit
PB: predicated region body
PF: predicated region fallthrough
CT: control target
= control target key end

     0   :  { %s4379_s0 = inlined_call_operand.vmem [shape: f32[2], index: 0, kind: input, shape index: {}]   ;;  %s4380_s1 = inlined_call_operand.vmem [shape: f32[16,1024], index: 1, kind: input, shape index: {}]   ;;  %s4381_s2 = inlined_call_operand.vmem [shape: f32[16,32], index: 2, kind: input, shape index: {}]   ;;  %s4382_s3 = inlined_call_operand.hbm [shape: bf16[1024,128], index: 3, kind: input, shape index: {}]   ;;  %s4383_s4 = inlined_call_operand.vmem [shape: f32[1,128], index: 4, kind: input, shape index: {}]   ;;  %s4384_s5 = inlined_call_operand.vmem [shape: bf16[128,32], index: 5, kind: input, shape index: {}]   ;;  %s4385_s6 = inlined_call_operand.vmem [shape: f32[1,32], index: 6, kind: input, shape index: {}]   ;;  %s4386_s7 = inlined_call_operand.vmem [shape: bf16[128,32], index: 7, kind: input, shape index: {}]   ;;  %s4387_s8 = inlined_call_operand.vmem [shape: f32[1,32], index: 8, kind: input, shape index: {}]   ;;  %s4388_s9 = inlined_call_operand.vmem [shape: bf16[32,128], index: 9, kind: input, shape index: {}]   ;;  %s4389_s10 = inlined_call_operand.vmem [shape: f32[1,128], index: 10, kind: input, shape index: {}]   ;;  %s4390_s11 = inlined_call_operand.hbm [shape: bf16[128,1024], index: 11, kind: input, shape index: {}]   ;;  %s4391_s12 = inlined_call_operand.vmem [shape: f32[1,1024], index: 12, kind: input, shape index: {}]   ;;  %s4392_s13 = inlined_call_operand.hbm [shape: bf16[128,1024], index: 13, kind: input, shape index: {}]   ;;  %s4393_s14 = inlined_call_operand.vmem [shape: f32[1,1024], index: 14, kind: input, shape index: {}]   ;;  %s4394_s15 = inlined_call_operand.vmem [shape: f32[16,128], index: 15, kind: output, shape index: {0}]   ;;  %s4395_s16 = inlined_call_operand.vmem [shape: bf16[16,1024], index: 16, kind: output, shape index: {1}]   ;;  %s4396_s17 = inlined_call_operand.vmem [shape: bf16[16,1024], index: 17, kind: output, shape index: {2}]  }
   0x1   :  { %4398 = sst [smem:[#allocation12_spill]] %s4379_s0 }
   0x2   :  { %4399 = sst [smem:[#allocation13_spill]] %s4380_s1 }
   0x3   :  { %23 = vsyncpa [#allocation4], 0 }
   0x4   :  { %24 = vsyncpa [#allocation3], 0 }
   0x5   :  { %25 = vsyncpa [#allocation7], 0  ;;  %s3671_s24 = smov [#allocation6]   ;;  %s4400_s28 = sld [smem:[#allocation12_spill]] }
   0x6   :  { %s71_s25 = sshll.u32 %s3671_s24, 4  ;;  %s72_s25 = int_to_ptr.vmem [resolvable:$true] %s71_s25 }
   0x7   :  { %s3601_s0 = scalar_lea.vmem %s72_s25, 8192  ;;  %p3606_p1 = scmp.lt.s32.totalorder %s72_s25, %s72_s25 }
   0x8   :  { %p3602_p0 = scmp.ne.s32.totalorder %s72_s25, %s3601_s0  ;;  %p3607_p2 = scmp.lt.s32.totalorder %s3601_s0, %s3601_s0 }
   0xa   :  { %p3608_p3 = por %p3607_p2, %p3606_p1 }
   0xb   :  { %s32_s29 = sshll.u32 %s4400_s28, 4  ;;  %s33_s29 = int_to_ptr.vmem [resolvable:$true] %s32_s29 }
   0xc   :  { %p3609_p4 = pnand %p3608_p3, %p3602_p0 }
   0xe   :  { %3612 = shalt.err (!%p3609_p4)
}
   0xf   :  { %s3672_s30 = smov 512   ;;  %s3673_s18 = smov 32  }
  0x10   :  { %77 = dma.hbm_to_vmem [thread:$0]  %s4390_s11, 8192, %s72_s25, [#allocation7], %s3672_s30, %s3672_s30, %s3673_s18  }
  0x11   :  { %s3613_s20 = scalar_lea.vmem %s33_s29, 16  ;;  %p3618_p6 = scmp.lt.s32.totalorder %s33_s29, %s33_s29 }
  0x12   :  { %p3614_p5 = scmp.ne.s32.totalorder %s33_s29, %s3613_s20  ;;  %p3619_p7 = scmp.lt.s32.totalorder %s3613_s20, %s3613_s20 }
  0x14   :  { %p3620_p8 = por %p3619_p7, %p3618_p6 }
  0x16   :  { %p3621_p9 = pnand %p3620_p8, %p3614_p5 }
  0x18   :  { %3624 = shalt.err (!%p3621_p9)
}
  0x19   :  { %s3674_s21 = smov [#allocation2]   ;;  %s3675_s22 = smov [#allocation5]  }
  0x1a   :  { %35 = dma.vmem_to_smem %s33_s29, 16, %s3674_s21, [#allocation4]  }
  0x1b   :  { %s45_s23 = sshll.u32 %s3675_s22, 4  ;;  %s46_s23 = int_to_ptr.vmem [resolvable:$true] %s45_s23 }
  0x1c   :  { %s3633_s24 = scalar_lea.vmem %s46_s23, 8192  ;;  %p3638_p11 = scmp.lt.s32.totalorder %s46_s23, %s46_s23 }
  0x1d   :  { %p3634_p10 = scmp.ne.s32.totalorder %s46_s23, %s3633_s24  ;;  %p3639_p12 = scmp.lt.s32.totalorder %s3633_s24, %s3633_s24 }
  0x1f   :  { %p3640_p13 = por %p3639_p12, %p3638_p11 }
  0x21   :  { %p3641_p0 = pnand %p3640_p13, %p3634_p10 }
  0x23   :  { %3644 = shalt.err (!%p3641_p0)
}
  0x24   :  { %s3676_s11 = smov 64   ;;  %s3677_s25 = smov 4  }
  0x25   :  { %51 = dma.hbm_to_vmem [thread:$0]  %s4382_s3, 8192, %s46_s23, [#allocation3], %s3676_s11, %s3676_s11, %s3677_s25  }
  0x26   :  { %s3678_s28 = smov [#allocation8]  }
  0x27   :  { %s85_s29 = sshll.u32 %s3678_s28, 4  ;;  %s86_s29 = int_to_ptr.vmem [resolvable:$true] %s85_s29 }
  0x28   :  { %s3653_s0 = scalar_lea.vmem %s86_s29, 8192  ;;  %p3658_p2 = scmp.lt.s32.totalorder %s86_s29, %s86_s29 }
  0x29   :  { %p3654_p1 = scmp.ne.s32.totalorder %s86_s29, %s3653_s0  ;;  %p3659_p3 = scmp.lt.s32.totalorder %s3653_s0, %s3653_s0 }
  0x2b   :  { %p3660_p4 = por %p3659_p3, %p3658_p2 }
  0x2d   :  { %p3661_p5 = pnand %p3660_p4, %p3654_p1 }
  0x2f   :  { %3664 = shalt.err (!%p3661_p5)
}
  0x30   :  { %91 = dma.hbm_to_vmem [thread:$0]  %s4392_s13, 8192, %s86_s29, [#allocation7], %s3672_s30, %s3672_s30, %s3673_s18  }
  0x31   :  { %3665 = dma.done.wait [#allocation4], 16  }
  0x32   :  { %3666 = vsyncadd [#allocation4], 4294967280 }
  0x33   :  { %3667 = dma.done.wait [#allocation3], 8192  }
  0x34   :  { %3668 = vsyncadd [#allocation3], 4294959104 }
  0x35   :  { %3669 = dma.done.wait [#allocation7], 16384  }
  0x36   :  { %3670 = vsyncadd [#allocation7], 4294950912 }
  0x37   :  { %106 = sfence }
  0x38   :  { %v3371_v0 = vld [vmem:[#allocation5 + $0x78] sm:$0xff]   ;;  %v3375_v4 = vld [vmem:[#allocation5 + $0x70] sm:$0xff]   ;;  %v3379_v8 = vld [vmem:[#allocation5 + $0x68] sm:$0xff]   ;;  %s4401_s30 = sld [smem:[#allocation13_spill]]  ;;  %vm3680_vm0 = vmmov 0   ;;  %vm1114_vm9 = vcmask 261120  }
  0x39   :  { %v3372_v1 = vld [vmem:[#allocation5 + $0xf8] sm:$0xff]   ;;  %3203 = vmatprep.subr.bf16.mxu0 %v3371_v0  ;;  %v3376_v5 = vld [vmem:[#allocation5 + $0xf0] sm:$0xff]   ;;  %v3380_v9 = vld [vmem:[#allocation5 + $0xe8] sm:$0xff]   ;;  %vm1117_vm10 = vcmask 523264   ;;  %vm1120_vm11 = vcmask 785408   ;;  %s2776_s25 = sld [smem:[#allocation2]] }
  0x3a   :  { %v3373_v2 = vld [vmem:[#allocation5 + $0x38] sm:$0xff]   ;;  %3225 = vmatprep.subr.bf16.mxu1 %v3372_v1  ;;  %v3377_v6 = vld [vmem:[#allocation5 + $0x30] sm:$0xff]   ;;  %v3381_v10 = vld [vmem:[#allocation5 + $0x28] sm:$0xff]  }
  0x3b   :  { %v3374_v3 = vld [vmem:[#allocation5 + $0xb8] sm:$0xff]   ;;  %3204 = vmatpush3.bf16.msra.mxu0 %v3373_v2  ;;  %v3378_v7 = vld [vmem:[#allocation5 + $0xb0] sm:$0xff]   ;;  %v3382_v11 = vld [vmem:[#allocation5 + $0xa8] sm:$0xff]  }
  0x3c   :  { %3226 = vmatpush3.bf16.msra.mxu1 %v3374_v3  ;;  %3205 = vmatprep.subr.bf16.mxu0 %v3375_v4  ;;  %v3383_v12 = vld [vmem:[#allocation5 + $0x60] sm:$0xff]   ;;  %v3387_v16 = vld [vmem:[#allocation5 + $0x58] sm:$0xff]   ;;  %v3391_v20 = vld [vmem:[#allocation5 + $0x50] sm:$0xff]  }
  0x3d   :  { %3227 = vmatprep.subr.bf16.mxu1 %v3376_v5  ;;  %v3384_v13 = vld [vmem:[#allocation5 + $0xe0] sm:$0xff]   ;;  %v3388_v17 = vld [vmem:[#allocation5 + $0xd8] sm:$0xff]   ;;  %v3392_v21 = vld [vmem:[#allocation5 + $0xd0] sm:$0xff]  }
  0x3e   :  { %v3385_v14 = vld [vmem:[#allocation5 + $0x20] sm:$0xff]   ;;  %v3389_v18 = vld [vmem:[#allocation5 + $0x18] sm:$0xff]   ;;  %v3393_v22 = vld [vmem:[#allocation5 + $0x10] sm:$0xff]  }
  0x3f   :  { %3206 = vmatpush3.bf16.msra.mxu0 %v3377_v6  ;;  %v3386_v15 = vld [vmem:[#allocation5 + $0xa0] sm:$0xff]   ;;  %v3390_v19 = vld [vmem:[#allocation5 + $0x98] sm:$0xff]   ;;  %v3394_v23 = vld [vmem:[#allocation5 + $0x90] sm:$0xff]  }
  0x40   :  { %3228 = vmatpush3.bf16.msra.mxu1 %v3378_v7  ;;  %3207 = vmatprep.subr.bf16.mxu0 %v3379_v8  ;;  %v3395_v24 = vld [vmem:[#allocation5 + $0x48] sm:$0xff]   ;;  %v3399_v28 = vld [vmem:[#allocation5 + $0x40] sm:$0xff]   ;;  %v111_v34 = vld [vmem:[%s4401_s30 + $0x18] sm:$0xff] }
  0x41   :  { %3229 = vmatprep.subr.bf16.mxu1 %v3380_v9  ;;  %v3396_v25 = vld [vmem:[#allocation5 + $0xc8] sm:$0xff]   ;;  %v3400_v29 = vld [vmem:[#allocation5 + $0xc0] sm:$0xff]   ;;  %v119_v36 = vld [vmem:[%s4401_s30 + $0x58] sm:$0xff] }
  0x42   :  { %v3397_v26 = vld [vmem:[#allocation5 + $0x8] sm:$0xff]   ;;  %v3401_v30 = vld [vmem:[#allocation5] sm:$0xff]   ;;  %v127_v39 = vpack.c.bf16 %v119_v36, %v111_v34  ;;  %v110_v41 = vld [vmem:[%s4401_s30 + $0x10] sm:$0xff] }
  0x43   :  { %3208 = vmatpush3.bf16.msra.mxu0 %v3381_v10  ;;  %v3398_v27 = vld [vmem:[#allocation5 + $0x88] sm:$0xff]   ;;  %v3402_v31 = vld [vmem:[#allocation5 + $0x80] sm:$0xff]   ;;  %v118_v42 = vld [vmem:[%s4401_s30 + $0x50] sm:$0xff] }
  0x44   :  { %3230 = vmatpush3.bf16.msra.mxu1 %v3382_v11  ;;  %3209 = vmatprep.subr.bf16.mxu0 %v3383_v12  ;;  %v109_v32 = vld [vmem:[%s4401_s30 + $0x8] sm:$0xff]  ;;  %v108_v37 = vld [vmem:[%s4401_s30] sm:$0xff]  ;;  %v126_v43 = vpack.c.bf16 %v118_v42, %v110_v41  ;;  %v3403_v44 = vld [vmem:[#allocation5 + $0x178] sm:$0xff]  }
  0x45   :  { %3231 = vmatprep.subr.bf16.mxu1 %v3384_v13  ;;  %v117_v33 = vld [vmem:[%s4401_s30 + $0x48] sm:$0xff]  ;;  %v116_v38 = vld [vmem:[%s4401_s30 + $0x40] sm:$0xff]  ;;  %724 = vmatprep.mubr.bf16.mxu1 %v127_v39  ;;  %v3404_v45 = vld [vmem:[#allocation5 + $0x1f8] sm:$0xff]  }
  0x46   :  { %v125_v35 = vpack.c.bf16 %v117_v33, %v109_v32  ;;  %v124_v40 = vpack.c.bf16 %v116_v38, %v108_v37  ;;  %v3405_v46 = vld [vmem:[#allocation5 + $0x138] sm:$0xff]   ;;  %v3407_v48 = vld [vmem:[#allocation5 + $0x170] sm:$0xff]   ;;  %v3411_v52 = vld [vmem:[#allocation5 + $0x168] sm:$0xff]  }
  0x47   :  { %3210 = vmatpush3.bf16.msra.mxu0 %v3385_v14  ;;  %v3406_v47 = vld [vmem:[#allocation5 + $0x1b8] sm:$0xff]   ;;  %v3408_v49 = vld [vmem:[#allocation5 + $0x1f0] sm:$0xff]   ;;  %v3412_v53 = vld [vmem:[#allocation5 + $0x1e8] sm:$0xff]  }
  0x48   :  { %3232 = vmatpush3.bf16.msra.mxu1 %v3386_v15  ;;  %3211 = vmatprep.subr.bf16.mxu0 %v3387_v16  ;;  %v3409_v50 = vld [vmem:[#allocation5 + $0x130] sm:$0xff]   ;;  %v3413_v54 = vld [vmem:[#allocation5 + $0x128] sm:$0xff]   ;;  %v3415_v56 = vld [vmem:[#allocation5 + $0x160] sm:$0xff]  }
  0x49   :  { %3233 = vmatprep.subr.bf16.mxu1 %v3388_v17  ;;  %683 = vmatprep.mubr.bf16.mxu0 %v125_v35  ;;  %v3410_v51 = vld [vmem:[#allocation5 + $0x1b0] sm:$0xff]   ;;  %v3414_v55 = vld [vmem:[#allocation5 + $0x1a8] sm:$0xff]   ;;  %v3416_v57 = vld [vmem:[#allocation5 + $0x1e0] sm:$0xff]  }
  0x4a   :  { %v3417_v58 = vld [vmem:[#allocation5 + $0x120] sm:$0xff]   ;;  %v3419_v60 = vld [vmem:[#allocation5 + $0x158] sm:$0xff]   ;;  %v3423_v0 = vld [vmem:[#allocation5 + $0x150] sm:$0xff]  }
  0x4b   :  { %3212 = vmatpush3.bf16.msra.mxu0 %v3389_v18  ;;  %v3418_v59 = vld [vmem:[#allocation5 + $0x1a0] sm:$0xff]   ;;  %v3420_v61 = vld [vmem:[#allocation5 + $0x1d8] sm:$0xff]   ;;  %v3424_v1 = vld [vmem:[#allocation5 + $0x1d0] sm:$0xff]  }
  0x4c   :  { %3234 = vmatpush3.bf16.msra.mxu1 %v3390_v19  ;;  %3213 = vmatprep.subr.bf16.mxu0 %v3391_v20  ;;  %v3421_v62 = vld [vmem:[#allocation5 + $0x118] sm:$0xff]   ;;  %v3425_v2 = vld [vmem:[#allocation5 + $0x110] sm:$0xff]   ;;  %v3427_v4 = vld [vmem:[#allocation5 + $0x148] sm:$0xff]  }
  0x4d   :  { %3235 = vmatprep.subr.bf16.mxu1 %v3392_v21  ;;  %v3422_v63 = vld [vmem:[#allocation5 + $0x198] sm:$0xff]   ;;  %v3426_v3 = vld [vmem:[#allocation5 + $0x190] sm:$0xff]   ;;  %v3428_v5 = vld [vmem:[#allocation5 + $0x1c8] sm:$0xff]  }
  0x4e   :  { %v3429_v6 = vld [vmem:[#allocation5 + $0x108] sm:$0xff]   ;;  %v3431_v8 = vld [vmem:[#allocation5 + $0x140] sm:$0xff]   ;;  %v115_v14 = vld [vmem:[%s4401_s30 + $0x38] sm:$0xff] }
  0x4f   :  { %3214 = vmatpush3.bf16.msra.mxu0 %v3393_v22  ;;  %v3430_v7 = vld [vmem:[#allocation5 + $0x188] sm:$0xff]   ;;  %v3432_v9 = vld [vmem:[#allocation5 + $0x1c0] sm:$0xff]   ;;  %v123_v15 = vld [vmem:[%s4401_s30 + $0x78] sm:$0xff] }
  0x50   :  { %3236 = vmatpush3.bf16.msra.mxu1 %v3394_v23  ;;  %3215 = vmatprep.subr.bf16.mxu0 %v3395_v24  ;;  %v3433_v10 = vld [vmem:[#allocation5 + $0x100] sm:$0xff]   ;;  %v113_v12 = vld [vmem:[%s4401_s30 + $0x28] sm:$0xff]  ;;  %v131_v17 = vpack.c.bf16 %v123_v15, %v115_v14  ;;  %v114_v20 = vld [vmem:[%s4401_s30 + $0x30] sm:$0xff] }
  0x51   :  { %3237 = vmatprep.subr.bf16.mxu1 %v3396_v25  ;;  %v3434_v11 = vld [vmem:[#allocation5 + $0x180] sm:$0xff]   ;;  %v121_v13 = vld [vmem:[%s4401_s30 + $0x68] sm:$0xff]  ;;  %v122_v22 = vld [vmem:[%s4401_s30 + $0x70] sm:$0xff] }
  0x52   :  { %v129_v16 = vpack.c.bf16 %v121_v13, %v113_v12  ;;  %v112_v18 = vld [vmem:[%s4401_s30 + $0x20] sm:$0xff]  ;;  %v130_v23 = vpack.c.bf16 %v122_v22, %v114_v20  ;;  %v3435_v24 = vld [vmem:[%s4384_s5 + $0x38] sm:$0xff]   ;;  %v3445_v35 = vld [vmem:[%s4384_s5 + $0x10] sm:$0xff]  }
  0x53   :  { %3216 = vmatpush3.bf16.msra.mxu0 %v3397_v26  ;;  %v120_v19 = vld [vmem:[%s4401_s30 + $0x60] sm:$0xff]  ;;  %v3436_v25 = vld [vmem:[%s4386_s7 + $0x38] sm:$0xff]   ;;  %v3679_v26 = vmov 0.0   ;;  %v3446_v36 = vld [vmem:[%s4386_s7 + $0x10] sm:$0xff]  }
  0x54   :  { %3238 = vmatpush3.bf16.msra.mxu1 %v3398_v27  ;;  %3217 = vmatprep.subr.bf16.mxu0 %v3399_v28  ;;  %v128_v21 = vpack.c.bf16 %v120_v19, %v112_v18  ;;  %v3437_v27 = vld [vmem:[%s4384_s5 + $0x30] sm:$0xff]   ;;  %v3442_v32 = vld [vmem:[%s4386_s7 + $0x20] sm:$0xff]   ;;  %v3443_v33 = vld [vmem:[%s4384_s5 + $0x18] sm:$0xff]  }
  0x55   :  { %3239 = vmatprep.subr.bf16.mxu1 %v3400_v29  ;;  %v3438_v28 = vld [vmem:[%s4386_s7 + $0x30] sm:$0xff]   ;;  %v3439_v29 = vld [vmem:[%s4384_s5 + $0x28] sm:$0xff]   ;;  %v3444_v34 = vld [vmem:[%s4386_s7 + $0x18] sm:$0xff]  }
  0x56   :  { %v3447_v37 = vld [vmem:[%s4384_s5 + $0x8] sm:$0xff]   ;;  %v3449_v39 = vld [vmem:[%s4384_s5] sm:$0xff]  }
  0x57   :  { %3218 = vmatpush3.bf16.msra.mxu0 %v3401_v30  ;;  %v3440_v30 = vld [vmem:[%s4386_s7 + $0x28] sm:$0xff]   ;;  %v3452_v14 = vld [vmem:[%s4388_s9] sm:$0xff]  }
  0x58   :  { %3240 = vmatpush3.bf16.msra.mxu1 %v3402_v31  ;;  %3247 = vmatprep.subr.bf16.mxu0 %v3403_v44  ;;  %v3441_v31 = vld [vmem:[%s4384_s5 + $0x20] sm:$0xff]   ;;  %v3448_v38 = vld [vmem:[%s4386_s7 + $0x8] sm:$0xff]  }
  0x59   :  { %3269 = vmatprep.subr.bf16.mxu1 %v3404_v45  ;;  %v3451_v13 = vld [vmem:[%s4388_s9 + $0x8] sm:$0xff]   ;;  %v3013_v15 = vld [vmem:[%s4387_s8] ss:$0 sm:$0xff] }
  0x5a   :  { %684 = vmatmul.mubr.bf16.vlgmr.msra.gmra.mxu0 %v124_v40  ;;  %v3450_v40 = vld [vmem:[%s4386_s7] sm:$0xff]  }
  0x5b   :  { %725 = vmatmul.mubr.bf16.vlgmr.msra.gmra.mxu1 %v126_v43  ;;  %3248 = vmatpush3.bf16.msra.mxu0 %v3405_v46 }
  0x5c   :  { %3270 = vmatpush3.bf16.msra.mxu1 %v3406_v47  ;;  %3249 = vmatprep.subr.bf16.mxu0 %v3407_v48  ;;  %v2939_v48 = vld [vmem:[%s4383_s4] ss:$0 sm:$0xff] }
  0x5d   :  { %3271 = vmatprep.subr.bf16.mxu1 %v3408_v49  ;;  %765 = vmatprep.mubr.bf16.mxu0 %v129_v16 }
  0x5e   :  { %806 = vmatprep.mubr.bf16.mxu1 %v131_v17 }
  0x5f   :  { %3250 = vmatpush3.bf16.msra.mxu0 %v3409_v50 }
  0x60   :  { %3272 = vmatpush3.bf16.msra.mxu1 %v3410_v51  ;;  %3251 = vmatprep.subr.bf16.mxu0 %v3411_v52 }
  0x61   :  { %3273 = vmatprep.subr.bf16.mxu1 %v3412_v53 }
  0x63   :  { %3252 = vmatpush3.bf16.msra.mxu0 %v3413_v54 }
  0x64   :  { %3274 = vmatpush3.bf16.msra.mxu1 %v3414_v55  ;;  %3253 = vmatprep.subr.bf16.mxu0 %v3415_v56 }
  0x65   :  { %3275 = vmatprep.subr.bf16.mxu1 %v3416_v57 }
  0x67   :  { %3254 = vmatpush3.bf16.msra.mxu0 %v3417_v58 }
  0x68   :  { %3276 = vmatpush3.bf16.msra.mxu1 %v3418_v59  ;;  %3255 = vmatprep.subr.bf16.mxu0 %v3419_v60 }
  0x69   :  { %3277 = vmatprep.subr.bf16.mxu1 %v3420_v61 }
  0x6b   :  { %3256 = vmatpush3.bf16.msra.mxu0 %v3421_v62 }
  0x6c   :  { %3278 = vmatpush3.bf16.msra.mxu1 %v3422_v63  ;;  %3257 = vmatprep.subr.bf16.mxu0 %v3423_v0 }
  0x6d   :  { %3279 = vmatprep.subr.bf16.mxu1 %v3424_v1 }
  0x6f   :  { %3258 = vmatpush3.bf16.msra.mxu0 %v3425_v2 }
  0x70   :  { %3280 = vmatpush3.bf16.msra.mxu1 %v3426_v3  ;;  %3259 = vmatprep.subr.bf16.mxu0 %v3427_v4 }
  0x71   :  { %3281 = vmatprep.subr.bf16.mxu1 %v3428_v5 }
  0x73   :  { %3260 = vmatpush3.bf16.msra.mxu0 %v3429_v6 }
  0x74   :  { %3282 = vmatpush3.bf16.msra.mxu1 %v3430_v7  ;;  %3261 = vmatprep.subr.bf16.mxu0 %v3431_v8 }
  0x75   :  { %3283 = vmatprep.subr.bf16.mxu1 %v3432_v9 }
  0x77   :  { %3262 = vmatpush3.bf16.msra.mxu0 %v3433_v10 }
  0x78   :  { %3284 = vmatpush3.bf16.msra.mxu1 %v3434_v11  ;;  %3312 = vmatprep.subr.bf16.mxu0 %v3679_v26 }
  0x79   :  { %3332 = vmatprep.subr.bf16.mxu1 %v3679_v26 }
  0x7a   :  { %766 = vmatmul.mubr.bf16.vlgmr.msra.gmra.mxu0 %v128_v21 }
  0x7b   :  { %807 = vmatmul.mubr.bf16.vlgmr.msra.gmra.mxu1 %v130_v23  ;;  %3313 = vmatpush3.bf16.msra.mxu0 %v3435_v24 }
  0x7c   :  { %3333 = vmatpush3.bf16.msra.mxu1 %v3436_v25  ;;  %3314 = vmatprep.subr.bf16.mxu0 %v3679_v26 }
  0x7d   :  { %3334 = vmatprep.subr.bf16.mxu1 %v3679_v26  ;;  %3328 = vmatprep.mubr.msk.bf16.mxu0 %vm3680_vm0, %v3679_v26 }
  0x7e   :  { %3348 = vmatprep.mubr.msk.bf16.mxu1 %vm3680_vm0, %v3679_v26 }
  0x7f   :  { %3315 = vmatpush3.bf16.msra.mxu0 %v3437_v27 }
  0x80   :  { %3335 = vmatpush3.bf16.msra.mxu1 %v3438_v28  ;;  %3316 = vmatprep.subr.bf16.mxu0 %v3679_v26 }
  0x81   :  { %3336 = vmatprep.subr.bf16.mxu1 %v3679_v26 }
  0x83   :  { %3317 = vmatpush3.bf16.msra.mxu0 %v3439_v29 }
  0x84   :  { %3337 = vmatpush3.bf16.msra.mxu1 %v3440_v30  ;;  %3318 = vmatprep.subr.bf16.mxu0 %v3679_v26 }
  0x85   :  { %3338 = vmatprep.subr.bf16.mxu1 %v3679_v26 }
  0x87   :  { %3319 = vmatpush3.bf16.msra.mxu0 %v3441_v31 }
  0x88   :  { %3339 = vmatpush3.bf16.msra.mxu1 %v3442_v32  ;;  %3320 = vmatprep.subr.bf16.mxu0 %v3679_v26 }
  0x89   :  { %3340 = vmatprep.subr.bf16.mxu1 %v3679_v26 }
  0x8b   :  { %3321 = vmatpush3.bf16.msra.mxu0 %v3443_v33 }
  0x8c   :  { %3341 = vmatpush3.bf16.msra.mxu1 %v3444_v34  ;;  %3322 = vmatprep.subr.bf16.mxu0 %v3679_v26 }
  0x8d   :  { %3342 = vmatprep.subr.bf16.mxu1 %v3679_v26 }
  0x8f   :  { %3323 = vmatpush3.bf16.msra.mxu0 %v3445_v35 }
  0x90   :  { %3343 = vmatpush3.bf16.msra.mxu1 %v3446_v36  ;;  %3324 = vmatprep.subr.bf16.mxu0 %v3679_v26 }
  0x91   :  { %3344 = vmatprep.subr.bf16.mxu1 %v3679_v26 }
  0x93   :  { %3325 = vmatpush3.bf16.msra.mxu0 %v3447_v37 }
  0x94   :  { %3345 = vmatpush3.bf16.msra.mxu1 %v3448_v38  ;;  %3326 = vmatprep.subr.bf16.mxu0 %v3679_v26 }
  0x95   :  { %3346 = vmatprep.subr.bf16.mxu1 %v3679_v26 }
  0x97   :  { %3327 = vmatpush3.bf16.msra.mxu0 %v3449_v39 }
  0x98   :  { %3347 = vmatpush3.bf16.msra.mxu1 %v3450_v40  ;;  %3352 = vmatprep.subr.bf16.mxu0 %v3679_v26 }
 0x11a   :  { %v3219_v41 = vpop.f32.mrf.mxu0 }
 0x11b   :  { %v3241_v42 = vpop.f32.mrf.mxu1 }
 0x11c   :  { %v3220_v43 = vpop.f32.mrf.mxu0 }
 0x11d   :  { %v3242_v44 = vpop.f32.mrf.mxu1  ;;  %v3221_v46 = vadd.f32 %v3220_v43, %v3219_v41 }
 0x11e   :  { %v3222_v45 = vpop.f32.mrf.mxu0  ;;  %v3243_v51 = vadd.f32 %v3242_v44, %v3241_v42 }
 0x11f   :  { %v3244_v47 = vpop.f32.mrf.mxu1  ;;  %v686_v50 = vadd.f32 %v3221_v46, %v2939_v48 }
 0x120   :  { %v3223_v49 = vpop.f32.mrf.mxu0 }
 0x121   :  { %v3224_v52 = vadd.f32 %v3223_v49, %v3222_v45  ;;  %v3245_v53 = vpop.f32.mrf.mxu1  ;;  %v727_v57 = vadd.f32 %v3243_v51, %v686_v50 }
 0x122   :  { %v3246_v62 = vadd.f32 %v3245_v53, %v3244_v47 }
 0x123   :  { %v689_v58 = vadd.f32 %v3224_v52, %v2939_v48 }
 0x125   :  { %v730_v2 = vadd.f32 %v3246_v62, %v689_v58  ;;  %v1256_v62 = vld [vmem:[#allocation6 + $0x1e0] sm:$0xff] }
 0x13a   :  { %v3263_v54 = vpop.f32.mrf.mxu0 }
 0x13b   :  { %v3285_v55 = vpop.f32.mrf.mxu1 }
 0x13c   :  { %v3264_v56 = vpop.f32.mrf.mxu0 }
 0x13d   :  { %v3265_v59 = vadd.f32 %v3264_v56, %v3263_v54  ;;  %v3286_v60 = vpop.f32.mrf.mxu1 }
 0x13e   :  { %v3266_v61 = vpop.f32.mrf.mxu0  ;;  %v3287_v3 = vadd.f32 %v3286_v60, %v3285_v55 }
 0x13f   :  { %v768_v63 = vadd.f32 %v3265_v59, %v727_v57  ;;  %v3288_v0 = vpop.f32.mrf.mxu1  ;;  %v3004_v57 = vld [vmem:[%s4385_s6] ss:$0 sm:$0xff] }
 0x140   :  { %v3267_v1 = vpop.f32.mrf.mxu0  ;;  %v1092_v59 = vld [vmem:[%s4381_s2] sm:$0xff] }
 0x141   :  { %v3268_v4 = vadd.f32 %v3267_v1, %v3266_v61  ;;  %v3289_v5 = vpop.f32.mrf.mxu1  ;;  %v809_v6 = vadd.f32 %v3287_v3, %v768_v63  ;;  %v1252_v61 = vld [vmem:[#allocation6 + $0x1c0] sm:$0xff]  ;;  %v1253_v63 = vld [vmem:[#allocation6 + $0x1c8] sm:$0xff] }
 0x142   :  { %v3290_v8 = vadd.f32 %v3289_v5, %v3288_v0  ;;  %v3082_v1 = vcombine.low %v1252_v61, %v1256_v62  ;;  %v1257_v3 = vld [vmem:[#allocation6 + $0x1e8] sm:$0xff]  ;;  %v1248_v5 = vld [vmem:[#allocation6 + $0x1a0] sm:$0xff] }
 0x143   :  { %v771_v7 = vadd.f32 %v3268_v4, %v730_v2  ;;  %v815_v10 = vmax.f32 %v809_v6, 0.0  ;;  %v3083_v2 = vcombine.high %v1252_v61, %v1256_v62  ;;  %v1244_v4 = vld [vmem:[#allocation6 + $0x180] sm:$0xff]  ;;  %v1205_v62 = vld [vmem:[#allocation6 + $0x48] sm:$0xff] }
 0x144   :  { %v1208_v61 = vld [vmem:[#allocation6 + $0x60] sm:$0xff] }
 0x145   :  { %v812_v9 = vadd.f32 %v3290_v8, %v771_v7  ;;  %v3085_v8 = vcombine.high %v1253_v63, %v1257_v3  ;;  %1622 = vmatprep.subr.bf16.mxu1 %v3083_v2 }
 0x147   :  { %v816_v11 = vmax.f32 %v812_v9, 0.0  ;;  %v1236_v9 = vld [vmem:[#allocation6 + $0x140] sm:$0xff] }
 0x149   :  { %v817_v12 = vpack.c.bf16 %v816_v11, %v815_v10 }
 0x14b   :  { %3329 = vmatmul.mubr.bf16.vlgmr.msra.gmra.mxu0 %v817_v12  ;;  %3349 = vmatmul.mubr.bf16.vlgmr.msra.gmra.mxu1 %v817_v12 }
 0x14c   :  { %3356 = vmatprep.mubr.msk.bf16.mxu0 %vm3680_vm0, %v3679_v26  ;;  %3353 = vmatpush3.bf16.msra.mxu0 %v3451_v13  ;;  %v3075_v13 = vcombine.high %v1244_v4, %v1248_v5 }
 0x14d   :  { %3354 = vmatprep.subr.bf16.mxu0 %v3679_v26  ;;  %1623 = vmatpush1.bf16.msra.mxu1 %v3082_v1 }
 0x14e   :  { %1624 = vmatprep.subr.bf16.mxu1 %v3075_v13  ;;  %v1254_v13 = vld [vmem:[#allocation6 + $0x1d0] sm:$0xff] }
 0x150   :  { %3355 = vmatpush3.bf16.msra.mxu0 %v3452_v14  ;;  %v1240_v14 = vld [vmem:[#allocation6 + $0x160] sm:$0xff] }
 0x151   :  { %1665 = vmatprep.subr.bf16.mxu0 %v3085_v8  ;;  %v1201_v8 = vld [vmem:[#allocation6 + $0x28] sm:$0xff] }
 0x20b   :  { %v3924_v16 = vpop.f32.mrf.mxu0  ;;  %v1035_v17 = vpop.f32.mrf.mxu1 }
 0x20c   :  { %v1036_v18 = vadd.f32 %v3013_v15, %v1035_v17  ;;  %v3937_v10 = vadd.f32 %v3004_v57, %v3924_v16  ;;  %v1093_v17 = vld [vmem:[%s4381_s2 + $0x8] sm:$0xff]  ;;  %v3067_v16 = vcombine.high %v1236_v9, %v1240_v14 }
 0x20d   :  { %v3330_v19 = vpop.f32.mrf.mxu0  ;;  %v3350_v20 = vpop.f32.mrf.mxu1 }
 0x20e   :  { %v1048_v21 = vand.u32 2147483647, %v1036_v18  ;;  %v1042_v44 = vmax.f32 %v1036_v18, 0.0  ;;  %vm1044_vm2 = vcmp.ne.f32.partialorder %v1036_v18, %v1036_v18 }
 0x20f   :  { %v3926_v22 = vpop.f32.mrf.mxu0  ;;  %v1038_v23 = vpop.f32.mrf.mxu1 }
 0x210   :  { %v1050_v24 = vsub.f32 0.0, %v1048_v21  ;;  %v1039_v25 = vadd.f32 %v3013_v15, %v1038_v23  ;;  %v1228_v23 = vld [vmem:[#allocation6 + $0x100] sm:$0xff] }
 0x211   :  { %v3331_v26 = vpop.f32.mrf.mxu0  ;;  %v3351_v27 = vpop.f32.mrf.mxu1 }
 0x212   :  { %v1052_v28 = vmul.f32 1.442695, %v1050_v24  ;;  %v1049_v29 = vand.u32 2147483647, %v1039_v25  ;;  %v1043_v52 = vmax.f32 %v1039_v25, 0.0  ;;  %vm1045_vm4 = vcmp.ne.f32.partialorder %v1039_v25, %v1039_v25  ;;  %v1232_v24 = vld [vmem:[#allocation6 + $0x120] sm:$0xff] }
 0x213   :  { %v1245_v27 = vld [vmem:[#allocation6 + $0x188] sm:$0xff] }
 0x214   :  { %3453 = vpow2.f32 %v1052_v28  ;;  %v1051_v30 = vsub.f32 0.0, %v1049_v29  ;;  %v1249_v28 = vld [vmem:[#allocation6 + $0x1a8] sm:$0xff]  ;;  %v3066_v29 = vcombine.low %v1236_v9, %v1240_v14  ;;  %v1258_v14 = vld [vmem:[#allocation6 + $0x1f0] sm:$0xff] }
 0x216   :  { %v1054_v31 = vmul.f32 1.442695, %v1051_v30 }
 0x218   :  { %3455 = vpow2.f32 %v1054_v31  ;;  %v3059_v31 = vcombine.high %v1228_v23, %v1232_v24 }
 0x221   :  { %v3454_v32 = vpop.eup %3453 }
 0x222   :  { %v1056_v33 = vadd.f32 1.0, %v3454_v32  ;;  %v1059_v36 = vmul.f32 -0.5, %v3454_v32  ;;  %v1062_v39 = vand.u32 2147483647, %v3454_v32 }
 0x224   :  { %3457 = vlog2.f32 %v1056_v33  ;;  %v1060_v37 = vadd.f32 1.0, %v1059_v36  ;;  %vm1063_vm1 = vcmp.lt.f32.partialorder %v1062_v39, 0.0004427343  ;;  %v1220_v33 = vld [vmem:[#allocation6 + $0xc0] sm:$0xff]  ;;  %v1237_v36 = vld [vmem:[#allocation6 + $0x148] sm:$0xff] }
 0x225   :  { %v3456_v34 = vpop.eup %3455 }
 0x226   :  { %v1065_v35 = vadd.f32 1.0, %v3456_v34  ;;  %v1068_v38 = vmul.f32 -0.5, %v3456_v34  ;;  %v1061_v42 = vmul.f32 %v3454_v32, %v1060_v37  ;;  %v1071_v45 = vand.u32 2147483647, %v3456_v34  ;;  %v1241_v37 = vld [vmem:[#allocation6 + $0x168] sm:$0xff] }
 0x227   :  { %v3084_v32 = vcombine.low %v1253_v63, %v1257_v3 }
 0x228   :  { %3459 = vlog2.f32 %v1065_v35  ;;  %v1069_v43 = vadd.f32 1.0, %v1068_v38  ;;  %vm1072_vm3 = vcmp.lt.f32.partialorder %v1071_v45, 0.0004427343  ;;  %v3058_v38 = vcombine.low %v1228_v23, %v1232_v24  ;;  %v1233_v45 = vld [vmem:[#allocation6 + $0x128] sm:$0xff] }
 0x22a   :  { %v1070_v50 = vmul.f32 %v3456_v34, %v1069_v43  ;;  %v1224_v34 = vld [vmem:[#allocation6 + $0xe0] sm:$0xff]  ;;  %v3069_v43 = vcombine.high %v1237_v36, %v1241_v37 }
 0x22b   :  { %v3051_v39 = vcombine.high %v1220_v33, %v1224_v34 }
 0x231   :  { %v3458_v40 = vpop.eup %3457 }
 0x232   :  { %v1058_v41 = vmul.f32 0.6931472, %v3458_v40  ;;  %v3076_v40 = vcombine.low %v1245_v27, %v1249_v28 }
 0x234   :  { %v1064_v46 = vsel %vm1063_vm1, %v1061_v42, %v1058_v41  ;;  %v1212_v41 = vld [vmem:[#allocation6 + $0x80] sm:$0xff] }
 0x235   :  { %v3460_v47 = vpop.eup %3459  ;;  %v1074_v48 = vadd.f32 %v1064_v46, %v1042_v44  ;;  %v1216_v42 = vld [vmem:[#allocation6 + $0xa0] sm:$0xff]  ;;  %v1229_v44 = vld [vmem:[#allocation6 + $0x108] sm:$0xff]  ;;  %v3050_v46 = vcombine.low %v1220_v33, %v1224_v34 }
 0x236   :  { %v1067_v49 = vmul.f32 0.6931472, %v3460_v47  ;;  %v3043_v47 = vcombine.high %v1212_v41, %v1216_v42 }
 0x237   :  { %v1076_v51 = vsel %vm1044_vm2, %v1036_v18, %v1074_v48  ;;  %v3074_v18 = vcombine.low %v1244_v4, %v1248_v5  ;;  %v3068_v48 = vcombine.low %v1237_v36, %v1241_v37  ;;  %v1196_v4 = vld [vmem:[#allocation6] sm:$0xff] }
 0x238   :  { %3461 = vrsqrt.f32 %v1076_v51  ;;  %v1073_v53 = vsel %vm1072_vm3, %v1070_v50, %v1067_v49  ;;  %1100 = vrot.lane.b32.xlu0 %v1076_v51, %s3673_s18  ;;  %vm1080_vm5 = vcmp.eq.f32.partialorder %v1076_v51, inf  ;;  %v1083_v60 = vand.u32 2147483648, %v1076_v51  ;;  %v1221_v50 = vld [vmem:[#allocation6 + $0xc8] sm:$0xff]  ;;  %v1200_v5 = vld [vmem:[#allocation6 + $0x20] sm:$0xff] }
 0x239   :  { %v1075_v54 = vadd.f32 %v1073_v53, %v1043_v52  ;;  %vm1082_vm6 = vcmp.eq.f32.partialorder %v1076_v51, 0.0  ;;  %1625 = vmatpush1.bf16.msra.mxu1 %v3074_v18  ;;  %v3061_v49 = vcombine.high %v1229_v44, %v1233_v45  ;;  %v3042_v52 = vcombine.low %v1212_v41, %v1216_v42  ;;  %v1251_v41 = vld [vmem:[#allocation6 + $0x1b8] sm:$0xff] }
 0x23a   :  { %1626 = vmatprep.subr.bf16.mxu1 %v3067_v16  ;;  %v3060_v53 = vcombine.low %v1229_v44, %v1233_v45  ;;  %v3026_v9 = vcombine.low %v1196_v4, %v1200_v5  ;;  %v3087_v18 = vcombine.high %v1254_v13, %v1258_v14 }
 0x23b   :  { %v1077_v55 = vsel %vm1045_vm4, %v1039_v25, %v1075_v54  ;;  %v3944_v25 = vadd.f32 %v3004_v57, %v3926_v22  ;;  %v3077_v22 = vcombine.high %v1245_v27, %v1249_v28 }
 0x23c   :  { %3463 = vrsqrt.f32 %v1077_v55  ;;  %1102 = vrot.lane.b32.xlu0 %v1077_v55, %s3673_s18  ;;  %vm1087_vm7 = vcmp.eq.f32.partialorder %v1077_v55, inf  ;;  %v1090_v15 = vand.u32 2147483648, %v1077_v55  ;;  %vm1089_vm8 = vcmp.eq.f32.partialorder %v1077_v55, 0.0 }
 0x23d   :  { %1627 = vmatpush1.bf16.msra.mxu1 %v3066_v29 }
 0x23e   :  { %1628 = vmatprep.subr.bf16.mxu1 %v3059_v31 }
 0x241   :  { %1629 = vmatpush1.bf16.msra.mxu1 %v3058_v38  ;;  %v1246_v38 = vld [vmem:[#allocation6 + $0x190] sm:$0xff] }
 0x242   :  { %1630 = vmatprep.subr.bf16.mxu1 %v3051_v39 }
 0x245   :  { %v3462_v56 = vpop.eup %3461  ;;  %1631 = vmatpush1.bf16.msra.mxu1 %v3050_v46 }
 0x246   :  { %v1079_v58 = vmul.f32 %v3462_v56, %v1076_v51  ;;  %1632 = vmatprep.subr.bf16.mxu1 %v3043_v47  ;;  %v1217_v56 = vld [vmem:[#allocation6 + $0xa8] sm:$0xff]  ;;  %v1238_v47 = vld [vmem:[#allocation6 + $0x150] sm:$0xff] }
 0x248   :  { %v1081_v0 = vsel %vm1080_vm5, %v1076_v51, %v1079_v58  ;;  %v1225_v51 = vld [vmem:[#allocation6 + $0xe8] sm:$0xff] }
 0x249   :  { %v3464_v6 = vpop.eup %3463  ;;  %v1084_v7 = vsel %vm1082_vm6, %v1083_v60, %v1081_v0  ;;  %v3053_v54 = vcombine.high %v1221_v50, %v1225_v51  ;;  %1633 = vmatpush1.bf16.msra.mxu1 %v3042_v52  ;;  %v3052_v57 = vcombine.low %v1221_v50, %v1225_v51  ;;  %v1204_v60 = vld [vmem:[#allocation6 + $0x40] sm:$0xff]  ;;  %v1209_v0 = vld [vmem:[#allocation6 + $0x68] sm:$0xff]  ;;  %v1243_v50 = vld [vmem:[#allocation6 + $0x178] sm:$0xff] }
 0x24a   :  { %v1094_v11 = vmul.f32 %v1092_v59, %v1084_v7  ;;  %v1086_v12 = vmul.f32 %v3464_v6, %v1077_v55  ;;  %v3035_v63 = vcombine.high %v1204_v60, %v1208_v61  ;;  %v3034_v1 = vcombine.low %v1204_v60, %v1208_v61  ;;  %v1197_v6 = vld [vmem:[#allocation6 + $0x8] sm:$0xff] }
 0x24b   :  { %v3036_v2 = vcombine.low %v1205_v62, %v1209_v0  ;;  %v3037_v3 = vcombine.high %v1205_v62, %v1209_v0  ;;  %v3027_v7 = vcombine.high %v1196_v4, %v1200_v5  ;;  %v1226_v0 = vld [vmem:[#allocation6 + $0xf0] sm:$0xff] }
 0x24c   :  { %v1096_v19 = vadd.f32 %v1094_v11, %v3937_v10  ;;  %v1088_v20 = vsel %vm1087_vm7, %v1077_v55, %v1086_v12  ;;  %v1213_v55 = vld [vmem:[#allocation6 + $0x88] sm:$0xff]  ;;  %1634 = vmatprep.subr.bf16.mxu1 %v3035_v63  ;;  %v3028_v11 = vcombine.low %v1197_v6, %v1201_v8  ;;  %v3029_v12 = vcombine.high %v1197_v6, %v1201_v8  ;;  %v1222_v63 = vld [vmem:[#allocation6 + $0xd0] sm:$0xff] }
 0x24d   :  { %v1091_v21 = vsel %vm1089_vm8, %v1090_v15, %v1088_v20  ;;  %v3045_v58 = vcombine.high %v1213_v55, %v1217_v56  ;;  %v3044_v59 = vcombine.low %v1213_v55, %v1217_v56  ;;  %1635 = vmatpush1.bf16.msra.mxu1 %v3034_v1  ;;  %v1255_v15 = vld [vmem:[#allocation6 + $0x1d8] sm:$0xff]  ;;  %v3681_v20 = vmov 0   ;;  %v1230_v55 = vld [vmem:[#allocation6 + $0x110] sm:$0xff] }
 0x24e   :  { %1108 = vrot.lane.b32.xlu1 %v1096_v19, %s3676_s11  ;;  %v1095_v26 = vmul.f32 %v1093_v17, %v1091_v21  ;;  %1636 = vmatprep.subr.bf16.mxu1 %v3027_v7  ;;  %v3086_v17 = vcombine.low %v1254_v13, %v1258_v14  ;;  %v1234_v56 = vld [vmem:[#allocation6 + $0x130] sm:$0xff]  ;;  %v1223_v1 = vld [vmem:[#allocation6 + $0xd8] sm:$0xff]  ;;  %v3055_v5 = vcombine.high %v1222_v63, %v1226_v0 }
 0x24f   :  { %1654 = vmatprep.mubr.bf16.mxu1 %v3681_v20  ;;  %v3063_v61 = vcombine.high %v1230_v55, %v1234_v56  ;;  %v1214_v7 = vld [vmem:[#allocation6 + $0x90] sm:$0xff] }
 0x250   :  { %v1097_v30 = vadd.f32 %v1095_v26, %v3944_v25  ;;  %v1218_v8 = vld [vmem:[#allocation6 + $0xb0] sm:$0xff] }
 0x251   :  { %1637 = vmatpush1.bf16.msra.mxu1 %v3026_v9  ;;  %v1215_v9 = vld [vmem:[#allocation6 + $0x98] sm:$0xff]  ;;  %v3047_v14 = vcombine.high %v1214_v7, %v1218_v8 }
 0x252   :  { %1110 = vrot.lane.b32.xlu1 %v1097_v30, %s3676_s11  ;;  %v1125_v35 = vpack.c.bf16 %v1097_v30, %v1096_v19  ;;  %v1259_v19 = vld [vmem:[#allocation6 + $0x1f8] sm:$0xff]  ;;  %1708 = vmatprep.subr.bf16.mxu1 %v3087_v18  ;;  %v1210_v18 = vld [vmem:[#allocation6 + $0x70] sm:$0xff] }
 0x253   :  { %v3088_v16 = vcombine.low %v1255_v15, %v1259_v19  ;;  %v3089_v21 = vcombine.high %v1255_v15, %v1259_v19  ;;  %v1207_v19 = vld [vmem:[#allocation6 + $0x58] sm:$0xff] }
 0x254   :  { %3357 = vmatmul.mubr.msk.bf16.vlgmr.msra.gmra.mxu0 %vm1114_vm9, %v1125_v35 }
 0x255   :  { %1666 = vmatpush1.bf16.msra.mxu0 %v3084_v32  ;;  %1697 = vmatprep.mubr.bf16.mxu0 %v3681_v20 }
 0x256   :  { %1667 = vmatprep.subr.bf16.mxu0 %v3077_v22 }
 0x259   :  { %1668 = vmatpush1.bf16.msra.mxu0 %v3076_v40  ;;  %v1250_v40 = vld [vmem:[#allocation6 + $0x1b0] sm:$0xff] }
 0x25a   :  { %1669 = vmatprep.subr.bf16.mxu0 %v3069_v43  ;;  %v3079_v45 = vcombine.high %v1246_v38, %v1250_v40  ;;  %v3078_v51 = vcombine.low %v1246_v38, %v1250_v40 }
 0x25d   :  { %1670 = vmatpush1.bf16.msra.mxu0 %v3068_v48  ;;  %v1242_v48 = vld [vmem:[#allocation6 + $0x170] sm:$0xff] }
 0x25e   :  { %1671 = vmatprep.subr.bf16.mxu0 %v3061_v49  ;;  %v1239_v49 = vld [vmem:[#allocation6 + $0x158] sm:$0xff] }
 0x25f   :  { %v3072_v60 = vcombine.low %v1239_v49, %v1243_v50 }
 0x261   :  { %1672 = vmatpush1.bf16.msra.mxu0 %v3060_v53  ;;  %v3071_v53 = vcombine.high %v1238_v47, %v1242_v48 }
 0x262   :  { %1673 = vmatprep.subr.bf16.mxu0 %v3053_v54  ;;  %v3073_v54 = vcombine.high %v1239_v49, %v1243_v50  ;;  %v1930_v49 = vld [vmem:[#allocation8 + $0x140] sm:$0xff] }
 0x263   :  { %v1934_v50 = vld [vmem:[#allocation8 + $0x160] sm:$0xff] }
 0x265   :  { %1674 = vmatpush1.bf16.msra.mxu0 %v3052_v57  ;;  %v1231_v57 = vld [vmem:[#allocation6 + $0x118] sm:$0xff] }
 0x266   :  { %1675 = vmatprep.subr.bf16.mxu0 %v3045_v58  ;;  %v1235_v58 = vld [vmem:[#allocation6 + $0x138] sm:$0xff] }
 0x267   :  { %v3065_v62 = vcombine.high %v1231_v57, %v1235_v58  ;;  %v3064_v4 = vcombine.low %v1231_v57, %v1235_v58  ;;  %v1922_v57 = vld [vmem:[#allocation8 + $0x100] sm:$0xff] }
 0x268   :  { %v1926_v58 = vld [vmem:[#allocation8 + $0x120] sm:$0xff] }
 0x269   :  { %1676 = vmatpush1.bf16.msra.mxu0 %v3044_v59  ;;  %v3070_v59 = vcombine.low %v1238_v47, %v1242_v48 }
 0x26a   :  { %1677 = vmatprep.subr.bf16.mxu0 %v3037_v3  ;;  %v3062_v3 = vcombine.low %v1230_v55, %v1234_v56  ;;  %v3147_v55 = vcombine.high %v1930_v49, %v1934_v50 }
 0x26d   :  { %1678 = vmatpush1.bf16.msra.mxu0 %v3036_v2  ;;  %v1227_v2 = vld [vmem:[#allocation6 + $0xf8] sm:$0xff] }
 0x26e   :  { %1679 = vmatprep.subr.bf16.mxu0 %v3029_v12  ;;  %v3057_v6 = vcombine.high %v1223_v1, %v1227_v2  ;;  %v3054_v12 = vcombine.low %v1222_v63, %v1226_v0  ;;  %v3056_v13 = vcombine.low %v1223_v1, %v1227_v2  ;;  %v3139_v63 = vcombine.high %v1922_v57, %v1926_v58  ;;  %v1914_v1 = vld [vmem:[#allocation8 + $0xc0] sm:$0xff] }
 0x26f   :  { %v1918_v2 = vld [vmem:[#allocation8 + $0xe0] sm:$0xff] }
 0x271   :  { %1680 = vmatpush1.bf16.msra.mxu0 %v3028_v11  ;;  %v1219_v11 = vld [vmem:[#allocation6 + $0xb8] sm:$0xff] }
 0x272   :  { %1751 = vmatprep.subr.bf16.mxu0 %v3089_v21  ;;  %v3049_v15 = vcombine.high %v1215_v9, %v1219_v11  ;;  %v3046_v21 = vcombine.low %v1214_v7, %v1218_v8  ;;  %v3131_v7 = vcombine.high %v1914_v1, %v1918_v2 }
 0x2aa   :  { %v1101_v23 = vpop.permute.xlu0 %1100 }
 0x2ab   :  { %v1115_v24 = vsel %vm1114_vm9, %v3937_v10, %v1101_v23  ;;  %v3022_v10 = vld [vmem:[%s4389_s10] ss:$0 sm:$0xff]  ;;  %v3048_v23 = vcombine.low %v1215_v9, %v1219_v11 }
 0x2ac   :  { %v1906_v9 = vld [vmem:[#allocation8 + $0x80] sm:$0xff] }
 0x2ad   :  { %v1910_v11 = vld [vmem:[#allocation8 + $0xa0] sm:$0xff] }
 0x2ae   :  { %v1103_v27 = vpop.permute.xlu0 %1102 }
 0x2af   :  { %v1116_v30 = vsel %vm1114_vm9, %v3944_v25, %v1103_v27  ;;  %v1247_v25 = vld [vmem:[#allocation6 + $0x198] sm:$0xff]  ;;  %v1198_v27 = vld [vmem:[#allocation6 + $0x10] sm:$0xff] }
 0x2b0   :  { %v3081_v46 = vcombine.high %v1247_v25, %v1251_v41  ;;  %v3080_v52 = vcombine.low %v1247_v25, %v1251_v41  ;;  %v1938_v25 = vld [vmem:[#allocation8 + $0x180] sm:$0xff] }
 0x2b1   :  { %v1942_v41 = vld [vmem:[#allocation8 + $0x1a0] sm:$0xff] }
 0x2b2   :  { %v3155_v47 = vcombine.high %v1938_v25, %v1942_v41 }
 0x2c0   :  { %v1109_v26 = vpop.permute.xlu1 %1108 }
 0x2c1   :  { %v1118_v28 = vsel %vm1117_vm10, %v1115_v24, %v1109_v26 }
 0x2c2   :  { %v1121_v29 = vsel %vm1120_vm11, %v1118_v28, 0.0  ;;  %v1202_v28 = vld [vmem:[#allocation6 + $0x30] sm:$0xff] }
 0x2c3   :  { %1123 = vst [vmem:[%s4394_s15] sm:$0xff] %v1121_v29  ;;  %v1199_v29 = vld [vmem:[#allocation6 + $0x18] sm:$0xff] }
 0x2c4   :  { %v1111_v31 = vpop.permute.xlu1 %1110 }
 0x2c5   :  { %v1119_v32 = vsel %vm1117_vm10, %v1116_v30, %v1111_v31  ;;  %v1203_v30 = vld [vmem:[#allocation6 + $0x38] sm:$0xff] }
 0x2c6   :  { %v1122_v33 = vsel %vm1120_vm11, %v1119_v32, 0.0  ;;  %v3032_v38 = vcombine.low %v1199_v29, %v1203_v30 }
 0x2c7   :  { %1124 = vst [vmem:[%s4394_s15 + $0x8] sm:$0xff] %v1122_v33  ;;  %v3031_v33 = vcombine.high %v1198_v27, %v1202_v28 }
 0x314   :  { %v1186_v34 = vpop.f32.mrf.mxu0 }
 0x315   :  { %v1187_v22 = vadd.f32 %v3022_v10, %v1186_v34  ;;  %v1946_v34 = vld [vmem:[#allocation8 + $0x1c0] sm:$0xff] }
 0x316   :  { %v3358_v35 = vpop.f32.mrf.mxu0 }
 0x317   :  { %v1193_v42 = vmax.f32 %v1187_v22, 0.0  ;;  %v1950_v35 = vld [vmem:[#allocation8 + $0x1e0] sm:$0xff]  ;;  %v1947_v22 = vld [vmem:[#allocation8 + $0x1c8] sm:$0xff] }
 0x318   :  { %v1189_v36 = vpop.f32.mrf.mxu0 }
 0x319   :  { %v1190_v37 = vadd.f32 %v3022_v10, %v1189_v36  ;;  %v3033_v10 = vcombine.high %v1199_v29, %v1203_v30  ;;  %v1951_v36 = vld [vmem:[#allocation8 + $0x1e8] sm:$0xff]  ;;  %v1890_v29 = vld [vmem:[#allocation8] sm:$0xff] }
 0x31a   :  { %v3359_v39 = vpop.f32.mrf.mxu0  ;;  %v3165_v40 = vcombine.high %v1947_v22, %v1951_v36  ;;  %v1894_v30 = vld [vmem:[#allocation8 + $0x20] sm:$0xff] }
 0x31b   :  { %v1194_v43 = vmax.f32 %v1190_v37, 0.0  ;;  %v3030_v37 = vcombine.low %v1198_v27, %v1202_v28  ;;  %v3163_v39 = vcombine.high %v1946_v34, %v1950_v35 }
 0x31d   :  { %v3965_v44 = vpack.c.bf16 %v1194_v43, %v1193_v42  ;;  %v1939_v42 = vld [vmem:[#allocation8 + $0x188] sm:$0xff] }
 0x31e   :  { %v1943_v43 = vld [vmem:[#allocation8 + $0x1a8] sm:$0xff] }
 0x31f   :  { %1655 = vmatmul.mubr.bf16.vlgmr.msra.gmra.mxu1 %v3965_v44  ;;  %1698 = vmatmul.mubr.bf16.vlgmr.msra.gmra.mxu0 %v3965_v44  ;;  %v3157_v48 = vcombine.high %v1939_v42, %v1943_v43 }
 0x320   :  { %1709 = vmatpush1.bf16.msra.mxu1 %v3086_v17  ;;  %1752 = vmatpush1.bf16.msra.mxu0 %v3088_v16  ;;  %v1206_v17 = vld [vmem:[#allocation6 + $0x50] sm:$0xff]  ;;  %v1211_v16 = vld [vmem:[#allocation6 + $0x78] sm:$0xff] }
 0x321   :  { %1710 = vmatprep.subr.bf16.mxu1 %v3079_v45  ;;  %1753 = vmatprep.subr.bf16.mxu0 %v3081_v46  ;;  %v3039_v24 = vcombine.high %v1206_v17, %v1210_v18  ;;  %v3041_v26 = vcombine.high %v1207_v19, %v1211_v16  ;;  %v3038_v31 = vcombine.low %v1206_v17, %v1210_v18 }
 0x322   :  { %1740 = vmatprep.mubr.bf16.mxu1 %v3681_v20  ;;  %1783 = vmatprep.mubr.bf16.mxu0 %v3681_v20  ;;  %v3040_v32 = vcombine.low %v1207_v19, %v1211_v16  ;;  %v3162_v45 = vcombine.low %v1946_v34, %v1950_v35  ;;  %v3164_v46 = vcombine.low %v1947_v22, %v1951_v36  ;;  %v1898_v19 = vld [vmem:[#allocation8 + $0x40] sm:$0xff]  ;;  %v1948_v22 = vld [vmem:[#allocation8 + $0x1d0] sm:$0xff] }
 0x323   :  { %v3123_v17 = vcombine.high %v1906_v9, %v1910_v11  ;;  %v1902_v16 = vld [vmem:[#allocation8 + $0x60] sm:$0xff]  ;;  %v3107_v34 = vcombine.high %v1890_v29, %v1894_v30  ;;  %v1952_v36 = vld [vmem:[#allocation8 + $0x1f0] sm:$0xff] }
 0x324   :  { %1711 = vmatpush1.bf16.msra.mxu1 %v3078_v51  ;;  %1754 = vmatpush1.bf16.msra.mxu0 %v3080_v52  ;;  %v1931_v51 = vld [vmem:[#allocation8 + $0x148] sm:$0xff]  ;;  %v3115_v27 = vcombine.high %v1898_v19, %v1902_v16 }
 0x325   :  { %1712 = vmatprep.subr.bf16.mxu1 %v3071_v53  ;;  %1755 = vmatprep.subr.bf16.mxu0 %v3073_v54  ;;  %v1935_v52 = vld [vmem:[#allocation8 + $0x168] sm:$0xff]  ;;  %v3154_v53 = vcombine.low %v1938_v25, %v1942_v41  ;;  %v3156_v54 = vcombine.low %v1939_v42, %v1943_v43  ;;  %v3167_v25 = vcombine.high %v1948_v22, %v1952_v36  ;;  %v1940_v42 = vld [vmem:[#allocation8 + $0x190] sm:$0xff] }
 0x326   :  { %v3149_v56 = vcombine.high %v1931_v51, %v1935_v52  ;;  %v1944_v43 = vld [vmem:[#allocation8 + $0x1b0] sm:$0xff] }
 0x328   :  { %1713 = vmatpush1.bf16.msra.mxu1 %v3070_v59  ;;  %1756 = vmatpush1.bf16.msra.mxu0 %v3072_v60  ;;  %v1923_v59 = vld [vmem:[#allocation8 + $0x108] sm:$0xff] }
 0x329   :  { %1714 = vmatprep.subr.bf16.mxu1 %v3063_v61  ;;  %1757 = vmatprep.subr.bf16.mxu0 %v3065_v62  ;;  %v1927_v60 = vld [vmem:[#allocation8 + $0x128] sm:$0xff]  ;;  %v3146_v61 = vcombine.low %v1930_v49, %v1934_v50  ;;  %v3148_v62 = vcombine.low %v1931_v51, %v1935_v52  ;;  %v3159_v49 = vcombine.high %v1940_v42, %v1944_v43  ;;  %v1932_v51 = vld [vmem:[#allocation8 + $0x150] sm:$0xff] }
 0x32a   :  { %v3141_v0 = vcombine.high %v1923_v59, %v1927_v60  ;;  %v1936_v52 = vld [vmem:[#allocation8 + $0x170] sm:$0xff] }
 0x32c   :  { %1715 = vmatpush1.bf16.msra.mxu1 %v3062_v3  ;;  %1758 = vmatpush1.bf16.msra.mxu0 %v3064_v4  ;;  %v1915_v3 = vld [vmem:[#allocation8 + $0xc8] sm:$0xff] }
 0x32d   :  { %1716 = vmatprep.subr.bf16.mxu1 %v3055_v5  ;;  %1759 = vmatprep.subr.bf16.mxu0 %v3057_v6  ;;  %v1919_v4 = vld [vmem:[#allocation8 + $0xe8] sm:$0xff]  ;;  %v3138_v5 = vcombine.low %v1922_v57, %v1926_v58  ;;  %v3140_v6 = vcombine.low %v1923_v59, %v1927_v60  ;;  %v3151_v57 = vcombine.high %v1932_v51, %v1936_v52  ;;  %v1924_v59 = vld [vmem:[#allocation8 + $0x110] sm:$0xff] }
 0x32e   :  { %v3133_v8 = vcombine.high %v1915_v3, %v1919_v4  ;;  %v1928_v60 = vld [vmem:[#allocation8 + $0x130] sm:$0xff] }
 0x330   :  { %1717 = vmatpush1.bf16.msra.mxu1 %v3054_v12  ;;  %1760 = vmatpush1.bf16.msra.mxu0 %v3056_v13  ;;  %v1907_v12 = vld [vmem:[#allocation8 + $0x88] sm:$0xff] }
 0x331   :  { %1718 = vmatprep.subr.bf16.mxu1 %v3047_v14  ;;  %1761 = vmatprep.subr.bf16.mxu0 %v3049_v15  ;;  %v1911_v13 = vld [vmem:[#allocation8 + $0xa8] sm:$0xff]  ;;  %v3130_v14 = vcombine.low %v1914_v1, %v1918_v2  ;;  %v3132_v15 = vcombine.low %v1915_v3, %v1919_v4  ;;  %v3143_v1 = vcombine.high %v1924_v59, %v1928_v60  ;;  %v1916_v3 = vld [vmem:[#allocation8 + $0xd0] sm:$0xff] }
 0x332   :  { %v3125_v18 = vcombine.high %v1907_v12, %v1911_v13  ;;  %v1920_v4 = vld [vmem:[#allocation8 + $0xf0] sm:$0xff] }
 0x334   :  { %1719 = vmatpush1.bf16.msra.mxu1 %v3046_v21  ;;  %1762 = vmatpush1.bf16.msra.mxu0 %v3048_v23  ;;  %v1899_v21 = vld [vmem:[#allocation8 + $0x48] sm:$0xff] }
 0x335   :  { %1720 = vmatprep.subr.bf16.mxu1 %v3039_v24  ;;  %1763 = vmatprep.subr.bf16.mxu0 %v3041_v26  ;;  %v1903_v23 = vld [vmem:[#allocation8 + $0x68] sm:$0xff]  ;;  %v3122_v24 = vcombine.low %v1906_v9, %v1910_v11  ;;  %v3124_v26 = vcombine.low %v1907_v12, %v1911_v13  ;;  %v3135_v9 = vcombine.high %v1916_v3, %v1920_v4  ;;  %v1908_v11 = vld [vmem:[#allocation8 + $0x90] sm:$0xff]  ;;  %v1909_v13 = vld [vmem:[#allocation8 + $0x98] sm:$0xff] }
 0x336   :  { %v3117_v28 = vcombine.high %v1899_v21, %v1903_v23  ;;  %v1912_v12 = vld [vmem:[#allocation8 + $0xb0] sm:$0xff] }
 0x338   :  { %1721 = vmatpush1.bf16.msra.mxu1 %v3038_v31  ;;  %1764 = vmatpush1.bf16.msra.mxu0 %v3040_v32  ;;  %v1891_v31 = vld [vmem:[#allocation8 + $0x8] sm:$0xff] }
 0x339   :  { %1722 = vmatprep.subr.bf16.mxu1 %v3031_v33  ;;  %1765 = vmatprep.subr.bf16.mxu0 %v3033_v10  ;;  %v1895_v32 = vld [vmem:[#allocation8 + $0x28] sm:$0xff]  ;;  %v3114_v33 = vcombine.low %v1898_v19, %v1902_v16  ;;  %v3116_v10 = vcombine.low %v1899_v21, %v1903_v23  ;;  %v1900_v16 = vld [vmem:[#allocation8 + $0x50] sm:$0xff]  ;;  %v1901_v23 = vld [vmem:[#allocation8 + $0x58] sm:$0xff] }
 0x33a   :  { %v3109_v35 = vcombine.high %v1891_v31, %v1895_v32  ;;  %v1904_v21 = vld [vmem:[#allocation8 + $0x70] sm:$0xff] }
 0x33c   :  { %1723 = vmatpush1.bf16.msra.mxu1 %v3030_v37  ;;  %1766 = vmatpush1.bf16.msra.mxu0 %v3032_v38  ;;  %v1949_v37 = vld [vmem:[#allocation8 + $0x1d8] sm:$0xff] }
 0x33d   :  { %2316 = vmatprep.subr.bf16.mxu1 %v3163_v39  ;;  %2359 = vmatprep.subr.bf16.mxu0 %v3165_v40  ;;  %v1953_v38 = vld [vmem:[#allocation8 + $0x1f8] sm:$0xff]  ;;  %v3106_v39 = vcombine.low %v1890_v29, %v1894_v30  ;;  %v3108_v40 = vcombine.low %v1891_v31, %v1895_v32  ;;  %v1892_v30 = vld [vmem:[#allocation8 + $0x10] sm:$0xff] }
 0x33e   :  { %v3169_v41 = vcombine.high %v1949_v37, %v1953_v38  ;;  %v1896_v31 = vld [vmem:[#allocation8 + $0x30] sm:$0xff]  ;;  %v1893_v32 = vld [vmem:[#allocation8 + $0x18] sm:$0xff] }
 0x33f   :  { %1741 = vmatmul.mubr.bf16.vlgmr.msra.gmra.mxu1 %v3965_v44  ;;  %1784 = vmatmul.mubr.bf16.vlgmr.msra.gmra.mxu0 %v3965_v44 }
 0x340   :  { %2317 = vmatpush1.bf16.msra.mxu1 %v3162_v45  ;;  %2360 = vmatpush1.bf16.msra.mxu0 %v3164_v46  ;;  %v1941_v45 = vld [vmem:[#allocation8 + $0x198] sm:$0xff] }
 0x341   :  { %2318 = vmatprep.subr.bf16.mxu1 %v3155_v47  ;;  %2361 = vmatprep.subr.bf16.mxu0 %v3157_v48  ;;  %v1945_v46 = vld [vmem:[#allocation8 + $0x1b8] sm:$0xff]  ;;  %v3166_v47 = vcombine.low %v1948_v22, %v1952_v36  ;;  %v3168_v48 = vcombine.low %v1949_v37, %v1953_v38  ;;  %v3110_v36 = vcombine.low %v1892_v30, %v1896_v31  ;;  %v1262_v38 = vlaneseq }
 0x342   :  { %2348 = vmatprep.mubr.bf16.mxu1 %v3681_v20  ;;  %2391 = vmatprep.mubr.bf16.mxu0 %v3681_v20  ;;  %v3161_v50 = vcombine.high %v1941_v45, %v1945_v46 }
 0x344   :  { %2319 = vmatpush1.bf16.msra.mxu1 %v3154_v53  ;;  %2362 = vmatpush1.bf16.msra.mxu0 %v3156_v54  ;;  %v1933_v53 = vld [vmem:[#allocation8 + $0x158] sm:$0xff] }
 0x345   :  { %2320 = vmatprep.subr.bf16.mxu1 %v3147_v55  ;;  %2363 = vmatprep.subr.bf16.mxu0 %v3149_v56  ;;  %v1937_v54 = vld [vmem:[#allocation8 + $0x178] sm:$0xff]  ;;  %v3158_v55 = vcombine.low %v1940_v42, %v1944_v43  ;;  %v3160_v56 = vcombine.low %v1941_v45, %v1945_v46 }
 0x346   :  { %v3153_v58 = vcombine.high %v1933_v53, %v1937_v54 }
 0x348   :  { %2321 = vmatpush1.bf16.msra.mxu1 %v3146_v61  ;;  %2364 = vmatpush1.bf16.msra.mxu0 %v3148_v62  ;;  %v1925_v61 = vld [vmem:[#allocation8 + $0x118] sm:$0xff] }
 0x349   :  { %2322 = vmatprep.subr.bf16.mxu1 %v3139_v63  ;;  %2365 = vmatprep.subr.bf16.mxu0 %v3141_v0  ;;  %v1929_v62 = vld [vmem:[#allocation8 + $0x138] sm:$0xff]  ;;  %v3150_v63 = vcombine.low %v1932_v51, %v1936_v52  ;;  %v3152_v0 = vcombine.low %v1933_v53, %v1937_v54 }
 0x34a   :  { %v3145_v2 = vcombine.high %v1925_v61, %v1929_v62 }
 0x34c   :  { %2323 = vmatpush1.bf16.msra.mxu1 %v3138_v5  ;;  %2366 = vmatpush1.bf16.msra.mxu0 %v3140_v6  ;;  %v1917_v5 = vld [vmem:[#allocation8 + $0xd8] sm:$0xff] }
 0x34d   :  { %2324 = vmatprep.subr.bf16.mxu1 %v3131_v7  ;;  %2367 = vmatprep.subr.bf16.mxu0 %v3133_v8  ;;  %v1921_v6 = vld [vmem:[#allocation8 + $0xf8] sm:$0xff]  ;;  %v3142_v7 = vcombine.low %v1924_v59, %v1928_v60  ;;  %v3144_v8 = vcombine.low %v1925_v61, %v1929_v62 }
 0x350   :  { %2325 = vmatpush1.bf16.msra.mxu1 %v3130_v14  ;;  %2368 = vmatpush1.bf16.msra.mxu0 %v3132_v15  ;;  %v1913_v14 = vld [vmem:[#allocation8 + $0xb8] sm:$0xff]  ;;  %v3134_v15 = vcombine.low %v1916_v3, %v1920_v4 }
 0x351   :  { %2326 = vmatprep.subr.bf16.mxu1 %v3123_v17  ;;  %2369 = vmatprep.subr.bf16.mxu0 %v3125_v18  ;;  %v3136_v17 = vcombine.low %v1917_v5, %v1921_v6  ;;  %v3127_v18 = vcombine.high %v1908_v11, %v1912_v12  ;;  %v3129_v19 = vcombine.high %v1909_v13, %v1913_v14 }
 0x354   :  { %2327 = vmatpush1.bf16.msra.mxu1 %v3122_v24  ;;  %2370 = vmatpush1.bf16.msra.mxu0 %v3124_v26  ;;  %v1905_v24 = vld [vmem:[#allocation8 + $0x78] sm:$0xff]  ;;  %v3126_v26 = vcombine.low %v1908_v11, %v1912_v12 }
 0x355   :  { %2328 = vmatprep.subr.bf16.mxu1 %v3115_v27  ;;  %2371 = vmatprep.subr.bf16.mxu0 %v3117_v28  ;;  %v3128_v27 = vcombine.low %v1909_v13, %v1913_v14  ;;  %v3119_v28 = vcombine.high %v1900_v16, %v1904_v21  ;;  %v3121_v29 = vcombine.high %v1901_v23, %v1905_v24 }
 0x358   :  { %2329 = vmatpush1.bf16.msra.mxu1 %v3114_v33  ;;  %2372 = vmatpush1.bf16.msra.mxu0 %v3116_v10  ;;  %v1897_v33 = vld [vmem:[#allocation8 + $0x38] sm:$0xff]  ;;  %v3118_v10 = vcombine.low %v1900_v16, %v1904_v21 }
 0x359   :  { %2330 = vmatprep.subr.bf16.mxu1 %v3107_v34  ;;  %2373 = vmatprep.subr.bf16.mxu0 %v3109_v35  ;;  %v3120_v34 = vcombine.low %v1901_v23, %v1905_v24  ;;  %v3111_v35 = vcombine.high %v1892_v30, %v1896_v31  ;;  %v3113_v22 = vcombine.high %v1893_v32, %v1897_v33 }
 0x35a   :  { %v3112_v37 = vcombine.low %v1893_v32, %v1897_v33 }
 0x35c   :  { %2331 = vmatpush1.bf16.msra.mxu1 %v3106_v39  ;;  %2374 = vmatpush1.bf16.msra.mxu0 %v3108_v40  ;;  %v3981_v39 = vshrl.u32 %v1262_v38, 7 }
 0x35d   :  { %2402 = vmatprep.subr.bf16.mxu1 %v3167_v25  ;;  %2445 = vmatprep.subr.bf16.mxu0 %v3169_v41  ;;  %v3988_v41 = vld [vmem:[%s4391_s12] sm:$0xff] }
 0x35e   :  { %v1264_v40 = vsub.s32 0, %v3981_v39  ;;  %v1272_v25 = vsub.s32 2, %v3981_v39  ;;  %v1268_v42 = vsub.s32 1, %v3981_v39  ;;  %v1276_v43 = vsub.s32 3, %v3981_v39 }
 0x35f   :  { %2349 = vmatmul.mubr.bf16.vlgmr.msra.gmra.mxu1 %v3965_v44  ;;  %2392 = vmatmul.mubr.bf16.vlgmr.msra.gmra.mxu0 %v3965_v44  ;;  %v1292_v30 = vsub.s32 7, %v3981_v39 }
 0x360   :  { %2403 = vmatpush1.bf16.msra.mxu1 %v3166_v47  ;;  %2446 = vmatpush1.bf16.msra.mxu0 %v3168_v48  ;;  %v1273_v45 = vrot.slane %v3988_v41, %v1272_v25  ;;  %v1269_v46 = vrot.slane %v3988_v41, %v1268_v42  ;;  %v1277_v47 = vrot.slane %v3988_v41, %v1276_v43 }
 0x361   :  { %2404 = vmatprep.subr.bf16.mxu1 %v3159_v49  ;;  %2447 = vmatprep.subr.bf16.mxu0 %v3161_v50 }
 0x362   :  { %2434 = vmatprep.mubr.bf16.mxu1 %v3681_v20  ;;  %2477 = vmatprep.mubr.bf16.mxu0 %v3681_v20  ;;  %v3137_v20 = vcombine.high %v1917_v5, %v1921_v6 }
 0x364   :  { %2405 = vmatpush1.bf16.msra.mxu1 %v3158_v55  ;;  %2448 = vmatpush1.bf16.msra.mxu0 %v3160_v56 }
 0x365   :  { %2406 = vmatprep.subr.bf16.mxu1 %v3151_v57  ;;  %2449 = vmatprep.subr.bf16.mxu0 %v3153_v58 }
 0x368   :  { %2407 = vmatpush1.bf16.msra.mxu1 %v3150_v63  ;;  %2450 = vmatpush1.bf16.msra.mxu0 %v3152_v0 }
 0x369   :  { %2408 = vmatprep.subr.bf16.mxu1 %v3143_v1  ;;  %2451 = vmatprep.subr.bf16.mxu0 %v3145_v2 }
 0x36c   :  { %2409 = vmatpush1.bf16.msra.mxu1 %v3142_v7  ;;  %2452 = vmatpush1.bf16.msra.mxu0 %v3144_v8 }
 0x36d   :  { %2410 = vmatprep.subr.bf16.mxu1 %v3135_v9  ;;  %2453 = vmatprep.subr.bf16.mxu0 %v3137_v20 }
 0x370   :  { %2411 = vmatpush1.bf16.msra.mxu1 %v3134_v15  ;;  %2454 = vmatpush1.bf16.msra.mxu0 %v3136_v17 }
 0x371   :  { %2412 = vmatprep.subr.bf16.mxu1 %v3127_v18  ;;  %2455 = vmatprep.subr.bf16.mxu0 %v3129_v19 }
 0x374   :  { %2413 = vmatpush1.bf16.msra.mxu1 %v3126_v26  ;;  %2456 = vmatpush1.bf16.msra.mxu0 %v3128_v27  ;;  %v1280_v26 = vsub.s32 4, %v3981_v39  ;;  %v1288_v27 = vsub.s32 6, %v3981_v39 }
 0x375   :  { %2414 = vmatprep.subr.bf16.mxu1 %v3119_v28  ;;  %2457 = vmatprep.subr.bf16.mxu0 %v3121_v29  ;;  %v1284_v29 = vsub.s32 5, %v3981_v39 }
 0x376   :  { %v1281_v31 = vrot.slane %v3988_v41, %v1280_v26  ;;  %v1289_v32 = vrot.slane %v3988_v41, %v1288_v27 }
 0x377   :  { %v1285_v33 = vrot.slane %v3988_v41, %v1284_v29 }
 0x378   :  { %2415 = vmatpush1.bf16.msra.mxu1 %v3118_v10  ;;  %2458 = vmatpush1.bf16.msra.mxu0 %v3120_v34  ;;  %v1293_v10 = vrot.slane %v3988_v41, %v1292_v30 }
 0x379   :  { %2416 = vmatprep.subr.bf16.mxu1 %v3111_v35  ;;  %2459 = vmatprep.subr.bf16.mxu0 %v3113_v22 }
 0x37c   :  { %2417 = vmatpush1.bf16.msra.mxu1 %v3110_v36  ;;  %2460 = vmatpush1.bf16.msra.mxu0 %v3112_v37 }
 0x37f   :  { %2435 = vmatmul.mubr.bf16.vlgmr.msra.gmra.mxu1 %v3965_v44  ;;  %2478 = vmatmul.mubr.bf16.vlgmr.msra.gmra.mxu0 %v3965_v44  ;;  %v1265_v44 = vrot.slane %v3988_v41, %v1264_v40 }
 0x3df   :  { %v1656_v48 = vpop.f32.mrf.mxu1  ;;  %v1699_v49 = vpop.f32.mrf.mxu0 }
 0x3e0   :  { %v1657_v50 = vadd.f32 %v1656_v48, %v1265_v44  ;;  %v1700_v51 = vadd.f32 %v1699_v49, %v1273_v45 }
 0x3e1   :  { %v1658_v52 = vpop.f32.mrf.mxu1  ;;  %v1701_v53 = vpop.f32.mrf.mxu0 }
 0x3e2   :  { %v3090_v54 = vmul.f32 -1.442695, %v1657_v50  ;;  %v3092_v55 = vmul.f32 -1.442695, %v1700_v51  ;;  %v1659_v56 = vadd.f32 %v1658_v52, %v1269_v46  ;;  %v1702_v57 = vadd.f32 %v1701_v53, %v1277_v47 }
 0x3e3   :  { %v1660_v58 = vpop.f32.mrf.mxu1  ;;  %v1703_v59 = vpop.f32.mrf.mxu0 }
 0x3e4   :  { %3465 = vpow2.f32 %v3090_v54  ;;  %v3091_v60 = vmul.f32 -1.442695, %v1659_v56  ;;  %v3093_v61 = vmul.f32 -1.442695, %v1702_v57  ;;  %v1661_v62 = vadd.f32 %v1660_v58, %v1265_v44 }
 0x3e5   :  { %3467 = vpow2.f32 %v3092_v55  ;;  %v1704_v63 = vadd.f32 %v1703_v59, %v1273_v45  ;;  %v1662_v0 = vpop.f32.mrf.mxu1  ;;  %v1705_v1 = vpop.f32.mrf.mxu0 }
 0x3e6   :  { %3469 = vpow2.f32 %v3091_v60  ;;  %v3098_v2 = vmul.f32 -1.442695, %v1661_v62  ;;  %v1663_v3 = vadd.f32 %v1662_v0, %v1269_v46  ;;  %v1706_v4 = vadd.f32 %v1705_v1, %v1277_v47 }
 0x3e7   :  { %3471 = vpow2.f32 %v3093_v61  ;;  %v3100_v5 = vmul.f32 -1.442695, %v1704_v63 }
 0x3e8   :  { %3473 = vpow2.f32 %v3098_v2  ;;  %v3099_v6 = vmul.f32 -1.442695, %v1663_v3  ;;  %v3101_v7 = vmul.f32 -1.442695, %v1706_v4 }
 0x3e9   :  { %3475 = vpow2.f32 %v3100_v5 }
 0x3ea   :  { %3477 = vpow2.f32 %v3099_v6 }
 0x3eb   :  { %3479 = vpow2.f32 %v3101_v7 }
 0x3f1   :  { %v3466_v8 = vpop.eup %3465 }
 0x3f2   :  { %v3468_v9 = vpop.eup %3467  ;;  %v1842_v20 = vadd.f32 1.0, %v3466_v8 }
 0x3f3   :  { %v3470_v11 = vpop.eup %3469  ;;  %v1844_v12 = vadd.f32 1.0, %v3468_v9 }
 0x3f4   :  { %v3472_v13 = vpop.eup %3471  ;;  %3481 = vrcp.f32 %v1842_v20  ;;  %v1843_v14 = vadd.f32 1.0, %v3470_v11 }
 0x3f5   :  { %v3474_v15 = vpop.eup %3473  ;;  %3483 = vrcp.f32 %v1844_v12  ;;  %v1845_v17 = vadd.f32 1.0, %v3472_v13 }
 0x3f6   :  { %v3476_v18 = vpop.eup %3475  ;;  %3485 = vrcp.f32 %v1843_v14  ;;  %v1850_v19 = vadd.f32 1.0, %v3474_v15 }
 0x3f7   :  { %v3478_v16 = vpop.eup %3477  ;;  %3487 = vrcp.f32 %v1845_v17  ;;  %v1852_v21 = vadd.f32 1.0, %v3476_v18 }
 0x3f8   :  { %v3480_v23 = vpop.eup %3479  ;;  %3489 = vrcp.f32 %v1850_v19  ;;  %v1851_v24 = vadd.f32 1.0, %v3478_v16 }
 0x3f9   :  { %3491 = vrcp.f32 %v1852_v21  ;;  %v1853_v28 = vadd.f32 1.0, %v3480_v23 }
 0x3fa   :  { %3493 = vrcp.f32 %v1851_v24 }
 0x3fb   :  { %3495 = vrcp.f32 %v1853_v28 }
 0x3ff   :  { %v1742_v34 = vpop.f32.mrf.mxu1  ;;  %v1785_v35 = vpop.f32.mrf.mxu0 }
 0x400   :  { %v1743_v22 = vadd.f32 %v1742_v34, %v1281_v31  ;;  %v1786_v36 = vadd.f32 %v1785_v35, %v1289_v32 }
 0x401   :  { %v3482_v37 = vpop.eup %3481  ;;  %v1744_v38 = vpop.f32.mrf.mxu1 }
 0x402   :  { %v1787_v44 = vpop.f32.mrf.mxu0  ;;  %v3484_v45 = vpop.eup %3483  ;;  %v3094_v46 = vmul.f32 -1.442695, %v1743_v22  ;;  %v3096_v47 = vmul.f32 -1.442695, %v1786_v36  ;;  %v1745_v48 = vadd.f32 %v1744_v38, %v1285_v33 }
 0x403   :  { %v1788_v49 = vadd.f32 %v1787_v44, %v1293_v10  ;;  %v3486_v50 = vpop.eup %3485  ;;  %v1746_v51 = vpop.f32.mrf.mxu1 }
 0x404   :  { %v1789_v52 = vpop.f32.mrf.mxu0  ;;  %v3488_v53 = vpop.eup %3487  ;;  %v3187_v54 = vpack.c.bf16 %v3486_v50, %v3482_v37  ;;  %3497 = vpow2.f32 %v3094_v46  ;;  %v3095_v55 = vmul.f32 -1.442695, %v1745_v48  ;;  %v1747_v58 = vadd.f32 %v1746_v51, %v1281_v31  ;;  %v4035_v31 = vld [vmem:[%s4393_s14] sm:$0xff] }
 0x405   :  { %v3097_v41 = vmul.f32 -1.442695, %v1788_v49  ;;  %v3490_v56 = vpop.eup %3489  ;;  %v3188_v57 = vpack.c.bf16 %v3488_v53, %v3484_v45  ;;  %3499 = vpow2.f32 %v3096_v47  ;;  %v1790_v59 = vadd.f32 %v1789_v52, %v1289_v32  ;;  %v1748_v60 = vpop.f32.mrf.mxu1 }
 0x406   :  { %v1791_v61 = vpop.f32.mrf.mxu0  ;;  %v3492_v62 = vpop.eup %3491  ;;  %2826 = vst [vmem:[%s4395_s16] sm:$0xff] %v3187_v54  ;;  %3501 = vpow2.f32 %v3095_v55  ;;  %v1749_v63 = vadd.f32 %v1748_v60, %v1285_v33  ;;  %v3102_v2 = vmul.f32 -1.442695, %v1747_v58  ;;  %v1959_v33 = vrot.slane %v4035_v31, %v1264_v40 }
 0x407   :  { %v1792_v0 = vadd.f32 %v1791_v61, %v1293_v10  ;;  %v3494_v1 = vpop.eup %3493  ;;  %2827 = vst [vmem:[%s4395_s16 + $0x8] sm:$0xff] %v3188_v57  ;;  %3503 = vpow2.f32 %v3097_v41  ;;  %v3104_v3 = vmul.f32 -1.442695, %v1790_v59  ;;  %v1967_v10 = vrot.slane %v4035_v31, %v1272_v25 }
 0x408   :  { %v3496_v4 = vpop.eup %3495  ;;  %v3191_v5 = vpack.c.bf16 %v3494_v1, %v3490_v56  ;;  %v3103_v6 = vmul.f32 -1.442695, %v1749_v63  ;;  %3505 = vpow2.f32 %v3102_v2  ;;  %v1963_v22 = vrot.slane %v4035_v31, %v1268_v42 }
 0x409   :  { %v3105_v7 = vmul.f32 -1.442695, %v1792_v0  ;;  %v3192_v8 = vpack.c.bf16 %v3496_v4, %v3492_v62  ;;  %3507 = vpow2.f32 %v3104_v3  ;;  %v1971_v36 = vrot.slane %v4035_v31, %v1276_v43 }
 0x40a   :  { %2830 = vst [vmem:[%s4395_s16 + $0x20] sm:$0xff] %v3191_v5  ;;  %3509 = vpow2.f32 %v3103_v6 }
 0x40b   :  { %2831 = vst [vmem:[%s4395_s16 + $0x28] sm:$0xff] %v3192_v8  ;;  %3511 = vpow2.f32 %v3105_v7 }
 0x411   :  { %v3498_v9 = vpop.eup %3497 }
 0x412   :  { %v3500_v20 = vpop.eup %3499  ;;  %v1846_v11 = vadd.f32 1.0, %v3498_v9 }
 0x413   :  { %v3502_v12 = vpop.eup %3501  ;;  %v1848_v13 = vadd.f32 1.0, %v3500_v20 }
 0x414   :  { %v3504_v14 = vpop.eup %3503  ;;  %3513 = vrcp.f32 %v1846_v11  ;;  %v1847_v15 = vadd.f32 1.0, %v3502_v12 }
 0x415   :  { %3515 = vrcp.f32 %v1848_v13  ;;  %v1849_v17 = vadd.f32 1.0, %v3504_v14  ;;  %v3506_v18 = vpop.eup %3505 }
 0x416   :  { %3517 = vrcp.f32 %v1847_v15  ;;  %v3508_v19 = vpop.eup %3507  ;;  %v1854_v16 = vadd.f32 1.0, %v3506_v18 }
 0x417   :  { %3519 = vrcp.f32 %v1849_v17  ;;  %v3510_v21 = vpop.eup %3509  ;;  %v1856_v23 = vadd.f32 1.0, %v3508_v19 }
 0x418   :  { %v3512_v24 = vpop.eup %3511  ;;  %3521 = vrcp.f32 %v1854_v16  ;;  %v1855_v28 = vadd.f32 1.0, %v3510_v21 }
 0x419   :  { %3523 = vrcp.f32 %v1856_v23  ;;  %v1857_v32 = vadd.f32 1.0, %v3512_v24 }
 0x41a   :  { %3525 = vrcp.f32 %v1855_v28 }
 0x41b   :  { %3527 = vrcp.f32 %v1857_v32 }
 0x41f   :  { %v2350_v34 = vpop.f32.mrf.mxu1  ;;  %v2393_v35 = vpop.f32.mrf.mxu0 }
 0x420   :  { %v4049_v37 = vadd.f32 %v2350_v34, %v1959_v33  ;;  %v4051_v38 = vadd.f32 %v2393_v35, %v1967_v10  ;;  %v4090_v34 = vrot.slane %v4035_v31, %v1280_v26  ;;  %v4095_v35 = vrot.slane %v4035_v31, %v1288_v27 }
 0x421   :  { %v3514_v44 = vpop.eup %3513  ;;  %v2352_v40 = vpop.f32.mrf.mxu1  ;;  %v4108_v26 = vrot.slane %v4035_v31, %v1292_v30 }
 0x422   :  { %v2395_v45 = vpop.f32.mrf.mxu0  ;;  %v3516_v46 = vpop.eup %3515  ;;  %v2536_v25 = vand.u32 2147483647, %v4049_v37  ;;  %v2538_v48 = vand.u32 2147483647, %v4051_v38  ;;  %v4055_v49 = vadd.f32 %v2352_v40, %v1963_v22  ;;  %v2490_v27 = vmax.f32 %v4051_v38, 0.0 }
 0x423   :  { %v3518_v47 = vpop.eup %3517  ;;  %v4057_v42 = vadd.f32 %v2395_v45, %v1971_v36  ;;  %v2354_v50 = vpop.f32.mrf.mxu1  ;;  %vm2504_vm14 = vcmp.ne.f32.partialorder %v4049_v37, %v4049_v37  ;;  %vm2506_vm15 = vcmp.ne.f32.partialorder %v4051_v38, %v4051_v38 }
 0x424   :  { %v2397_v51 = vpop.f32.mrf.mxu0  ;;  %v3520_v43 = vpop.eup %3519  ;;  %v3189_v52 = vpack.c.bf16 %v3518_v47, %v3514_v44  ;;  %v2552_v53 = vsub.f32 0.0, %v2536_v25  ;;  %v4059_v54 = vadd.f32 %v2354_v50, %v1959_v33  ;;  %v2554_v41 = vsub.f32 0.0, %v2538_v48 }
 0x425   :  { %v3190_v55 = vpack.c.bf16 %v3520_v43, %v3516_v46  ;;  %v3522_v56 = vpop.eup %3521  ;;  %v2537_v58 = vand.u32 2147483647, %v4055_v49  ;;  %v4065_v59 = vadd.f32 %v2397_v51, %v1967_v10  ;;  %v2539_v62 = vand.u32 2147483647, %v4057_v42  ;;  %v2356_v2 = vpop.f32.mrf.mxu1 }
 0x426   :  { %2828 = vst [vmem:[%s4395_s16 + $0x10] sm:$0xff] %v3189_v52  ;;  %v2568_v57 = vmul.f32 1.442695, %v2552_v53  ;;  %v3524_v60 = vpop.eup %3523  ;;  %v2572_v61 = vmul.f32 1.442695, %v2554_v41  ;;  %v2399_v3 = vpop.f32.mrf.mxu0  ;;  %v4076_v12 = vadd.f32 %v2356_v2, %v1963_v22  ;;  %v4100_v22 = vrot.slane %v4035_v31, %v1284_v29 }
 0x427   :  { %2829 = vst [vmem:[%s4395_s16 + $0x18] sm:$0xff] %v3190_v55  ;;  %v3526_v63 = vpop.eup %3525  ;;  %v2553_v0 = vsub.f32 0.0, %v2537_v58  ;;  %v2544_v1 = vand.u32 2147483647, %v4059_v54  ;;  %v2555_v6 = vsub.f32 0.0, %v2539_v62  ;;  %v4078_v13 = vadd.f32 %v2399_v3, %v1971_v36 }
 0x428   :  { %3529 = vpow2.f32 %v2568_v57  ;;  %v3528_v4 = vpop.eup %3527  ;;  %v3193_v5 = vpack.c.bf16 %v3526_v63, %v3522_v56  ;;  %v2546_v20 = vand.u32 2147483647, %v4065_v59  ;;  %v2545_v17 = vand.u32 2147483647, %v4076_v12 }
 0x429   :  { %3531 = vpow2.f32 %v2572_v61  ;;  %v3194_v7 = vpack.c.bf16 %v3528_v4, %v3524_v60  ;;  %v2570_v8 = vmul.f32 1.442695, %v2553_v0  ;;  %v2560_v9 = vsub.f32 0.0, %v2544_v1 }
 0x42a   :  { %2832 = vst [vmem:[%s4395_s16 + $0x30] sm:$0xff] %v3193_v5  ;;  %v2574_v11 = vmul.f32 1.442695, %v2555_v6  ;;  %v2562_v15 = vsub.f32 0.0, %v2546_v20  ;;  %v2561_v19 = vsub.f32 0.0, %v2545_v17  ;;  %v2488_v36 = vmax.f32 %v4049_v37, 0.0 }
 0x42b   :  { %2833 = vst [vmem:[%s4395_s16 + $0x38] sm:$0xff] %v3194_v7  ;;  %3533 = vpow2.f32 %v2570_v8  ;;  %v2584_v14 = vmul.f32 1.442695, %v2560_v9  ;;  %v2547_v16 = vand.u32 2147483647, %v4078_v13  ;;  %s4085_s16 = sld [smem:[#allocation2 + $0x1]]  ;;  %v4103_v44 = vstv %s2776_s25 }
 0x42c   :  { %3535 = vpow2.f32 %v2574_v11  ;;  %v2588_v18 = vmul.f32 1.442695, %v2562_v15  ;;  %v2586_v21 = vmul.f32 1.442695, %v2561_v19  ;;  %v2489_v46 = vmax.f32 %v4055_v49, 0.0 }
 0x42d   :  { %3537 = vpow2.f32 %v2584_v14  ;;  %v2563_v23 = vsub.f32 0.0, %v2547_v16  ;;  %v2491_v48 = vmax.f32 %v4057_v42, 0.0  ;;  %v2496_v50 = vmax.f32 %v4059_v54, 0.0 }
 0x42e   :  { %3539 = vpow2.f32 %v2588_v18  ;;  %v2498_v30 = vmax.f32 %v4065_v59, 0.0  ;;  %v2497_v57 = vmax.f32 %v4076_v12, 0.0  ;;  %v2499_v58 = vmax.f32 %v4078_v13, 0.0 }
 0x42f   :  { %3541 = vpow2.f32 %v2586_v21  ;;  %v2590_v24 = vmul.f32 1.442695, %v2563_v23  ;;  %vm2505_vm3 = vcmp.ne.f32.partialorder %v4055_v49, %v4055_v49  ;;  %vm2507_vm4 = vcmp.ne.f32.partialorder %v4057_v42, %v4057_v42 }
 0x430   :  { %vm2512_vm6 = vcmp.ne.f32.partialorder %v4059_v54, %v4059_v54  ;;  %vm2514_vm7 = vcmp.ne.f32.partialorder %v4065_v59, %v4065_v59  ;;  %vm2513_vm9 = vcmp.ne.f32.partialorder %v4076_v12, %v4076_v12  ;;  %vm2515_vm11 = vcmp.ne.f32.partialorder %v4078_v13, %v4078_v13 }
 0x431   :  { %3543 = vpow2.f32 %v2590_v24  ;;  %v4122_v0 = vstv %s4085_s16 }
 0x435   :  { %v3530_v28 = vpop.eup %3529 }
 0x436   :  { %v3532_v32 = vpop.eup %3531  ;;  %v2600_v33 = vadd.f32 1.0, %v3530_v28  ;;  %v2603_v45 = vmul.f32 -0.5, %v3530_v28  ;;  %v2606_v43 = vand.u32 2147483647, %v3530_v28 }
 0x437   :  { %v2618_v10 = vadd.f32 1.0, %v3532_v32  ;;  %v2621_v29 = vmul.f32 -0.5, %v3532_v32  ;;  %v2624_v39 = vand.u32 2147483647, %v3532_v32 }
 0x438   :  { %3545 = vlog2.f32 %v2600_v33  ;;  %v3534_v40 = vpop.eup %3533  ;;  %v2604_v56 = vadd.f32 1.0, %v2603_v45  ;;  %vm4117_vm12 = vcmp.lt.f32.partialorder %v2606_v43, 0.0004427343 }
 0x439   :  { %3547 = vlog2.f32 %v2618_v10  ;;  %v3536_v25 = vpop.eup %3535  ;;  %v2609_v47 = vadd.f32 1.0, %v3534_v40  ;;  %v2612_v31 = vmul.f32 -0.5, %v3534_v40  ;;  %v2622_v60 = vadd.f32 1.0, %v2621_v29 }
 0x43a   :  { %v3538_v51 = vpop.eup %3537  ;;  %v2627_v52 = vadd.f32 1.0, %v3536_v25  ;;  %v2630_v53 = vmul.f32 -0.5, %v3536_v25  ;;  %v2615_v1 = vand.u32 2147483647, %v3534_v40  ;;  %v2633_v2 = vand.u32 2147483647, %v3536_v25 }
 0x43b   :  { %3549 = vlog2.f32 %v2609_v47  ;;  %v2672_v55 = vadd.f32 1.0, %v3538_v51  ;;  %v3540_v41 = vpop.eup %3539  ;;  %v2675_v61 = vmul.f32 -0.5, %v3538_v51  ;;  %vm4124_vm13 = vcmp.lt.f32.partialorder %v2624_v39, 0.0004427343 }
 0x43c   :  { %3551 = vlog2.f32 %v2627_v52  ;;  %v2690_v62 = vadd.f32 1.0, %v3540_v41  ;;  %v3542_v5 = vpop.eup %3541  ;;  %v2613_v7 = vadd.f32 1.0, %v2612_v31  ;;  %v2631_v8 = vadd.f32 1.0, %v2630_v53 }
 0x43d   :  { %3553 = vlog2.f32 %v2672_v55  ;;  %v2693_v9 = vmul.f32 -0.5, %v3540_v41  ;;  %v2605_v20 = vmul.f32 %v3530_v28, %v2604_v56  ;;  %v2678_v11 = vand.u32 2147483647, %v3538_v51 }
 0x43e   :  { %3555 = vlog2.f32 %v2690_v62  ;;  %v2681_v14 = vadd.f32 1.0, %v3542_v5  ;;  %v4131_v17 = vpop.eup %3543  ;;  %v2623_v18 = vmul.f32 %v3532_v32, %v2622_v60  ;;  %v2676_v19 = vadd.f32 1.0, %v2675_v61 }
 0x43f   :  { %v2436_v3 = vpop.f32.mrf.mxu1  ;;  %v2479_v4 = vpop.f32.mrf.mxu0  ;;  %v2684_v16 = vmul.f32 -0.5, %v3542_v5  ;;  %vm4140_vm0 = vcmp.lt.f32.partialorder %v2615_v1, 0.0004427343  ;;  %v2696_v24 = vand.u32 2147483647, %v3540_v41  ;;  %v2699_v28 = vadd.f32 1.0, %v4131_v17 }
 0x440   :  { %v4129_v15 = vadd.f32 %v2436_v3, %v4090_v34  ;;  %v4136_v21 = vadd.f32 %v2479_v4, %v4095_v35  ;;  %3557 = vlog2.f32 %v2681_v14  ;;  %v2614_v33 = vmul.f32 %v3534_v40, %v2613_v7 }
 0x441   :  { %v2632_v10 = vmul.f32 %v3536_v25, %v2631_v8  ;;  %vm4145_vm1 = vcmp.lt.f32.partialorder %v2633_v2, 0.0004427343  ;;  %v2694_v45 = vadd.f32 1.0, %v2693_v9  ;;  %v2702_v29 = vmul.f32 -0.5, %v4131_v17  ;;  %v2438_v47 = vpop.f32.mrf.mxu1 }
 0x442   :  { %vm4150_vm2 = vcmp.lt.f32.partialorder %v2678_v11, 0.0004427343  ;;  %v2687_v52 = vand.u32 2147483647, %v3542_v5  ;;  %3559 = vlog2.f32 %v2699_v28  ;;  %v2540_v31 = vand.u32 2147483647, %v4129_v15 }
 0x443   :  { %v2677_v25 = vmul.f32 %v3538_v51, %v2676_v19  ;;  %v2685_v55 = vadd.f32 1.0, %v2684_v16  ;;  %v2542_v56 = vand.u32 2147483647, %v4136_v21  ;;  %vm4160_vm5 = vcmp.lt.f32.partialorder %v2696_v24, 0.0004427343 }
 0x444   :  { %v2556_v62 = vsub.f32 0.0, %v2540_v31  ;;  %v4165_v1 = vadd.f32 %v2438_v47, %v4100_v22  ;;  %v2695_v51 = vmul.f32 %v3540_v41, %v2694_v45  ;;  %v2703_v3 = vadd.f32 1.0, %v2702_v29  ;;  %v2481_v47 = vpop.f32.mrf.mxu0 }
 0x445   :  { %v3546_v43 = vpop.eup %3545  ;;  %v2558_v4 = vsub.f32 0.0, %v2542_v56  ;;  %v2705_v11 = vand.u32 2147483647, %v4131_v17  ;;  %v2686_v41 = vmul.f32 %v3542_v5, %v2685_v55  ;;  %vm4180_vm8 = vcmp.lt.f32.partialorder %v2687_v52, 0.0004427343 }
 0x446   :  { %v3548_v53 = vpop.eup %3547  ;;  %v2602_v40 = vmul.f32 0.6931472, %v3546_v43  ;;  %v2576_v14 = vmul.f32 1.442695, %v2556_v62  ;;  %v2704_v29 = vmul.f32 %v4131_v17, %v2703_v3 }
 0x447   :  { %v2620_v60 = vmul.f32 0.6931472, %v3548_v53  ;;  %vm2706_vm10 = vcmp.lt.f32.partialorder %v2705_v11, 0.0004427343 }
 0x448   :  { %v2608_v2 = vsel %vm4117_vm12, %v2605_v20, %v2602_v40  ;;  %v3550_v7 = vpop.eup %3549  ;;  %3561 = vpow2.f32 %v2576_v14  ;;  %v4215_v40 = vadd.f32 %v2481_v47, %v4108_v26 }
 0x449   :  { %v2744_v8 = vadd.f32 %v2608_v2, %v2488_v36  ;;  %v2626_v9 = vsel %vm4124_vm13, %v2623_v18, %v2620_v60  ;;  %v3552_v19 = vpop.eup %3551  ;;  %v2611_v20 = vmul.f32 0.6931472, %v3550_v7  ;;  %v2580_v36 = vmul.f32 1.442695, %v2558_v4 }
 0x44a   :  { %v2746_v63 = vadd.f32 %v2626_v9, %v2490_v27  ;;  %v3554_v24 = vpop.eup %3553  ;;  %v2629_v18 = vmul.f32 0.6931472, %v3552_v19  ;;  %v2541_v27 = vand.u32 2147483647, %v4165_v1  ;;  %vm2508_vm13 = vcmp.ne.f32.partialorder %v4129_v15, %v4129_v15 }
 0x44b   :  { %v2760_v6 = vsel %vm2504_vm14, %v4049_v37, %v2744_v8  ;;  %v2617_v28 = vsel %vm4140_vm0, %v2614_v33, %v2611_v20  ;;  %v2674_v45 = vmul.f32 0.6931472, %v3554_v24  ;;  %v3556_v43 = vpop.eup %3555  ;;  %3563 = vpow2.f32 %v2580_v36  ;;  %v2483_v20 = vpop.f32.mrf.mxu0 }
 0x44c   :  { %v2762_v5 = vsel %vm2506_vm15, %v4051_v38, %v2746_v63  ;;  %v2835_v52 = vmul.f32 %v4103_v44, %v2760_v6  ;;  %v2745_v37 = vadd.f32 %v2617_v28, %v2489_v46  ;;  %v2635_v31 = vsel %vm4145_vm1, %v2632_v10, %v2629_v18  ;;  %v2440_v38 = vpop.f32.mrf.mxu1 }
 0x44d   :  { %v2837_v23 = vmul.f32 %v4103_v44, %v2762_v5  ;;  %v2747_v17 = vadd.f32 %v2635_v31, %v2491_v48  ;;  %v2680_v33 = vsel %vm4150_vm2, %v2677_v25, %v2674_v45  ;;  %v2692_v53 = vmul.f32 0.6931472, %v3556_v43  ;;  %v3558_v55 = vpop.eup %3557  ;;  %v2485_v28 = vpop.f32.mrf.mxu0 }
 0x44e   :  { %v2761_v46 = vsel %vm2505_vm3, %v4055_v49, %v2745_v37  ;;  %v2752_v10 = vadd.f32 %v2680_v33, %v2496_v50  ;;  %v2557_v32 = vsub.f32 0.0, %v2541_v27  ;;  %v4225_v49 = vadd.f32 %v2440_v38, %v4090_v34  ;;  %v2442_v5 = vpop.f32.mrf.mxu1 }
 0x44f   :  { %v2836_v56 = vmul.f32 %v4103_v44, %v2761_v46  ;;  %v2763_v48 = vsel %vm2507_vm4, %v4057_v42, %v2747_v17  ;;  %v2698_v39 = vsel %vm4160_vm5, %v2695_v51, %v2692_v53  ;;  %v2683_v62 = vmul.f32 0.6931472, %v3558_v55  ;;  %v3560_v2 = vpop.eup %3559 }
 0x450   :  { %v2838_v50 = vmul.f32 %v4103_v44, %v2763_v48  ;;  %v2768_v25 = vsel %vm2512_vm6, %v4059_v54, %v2752_v10  ;;  %v2754_v60 = vadd.f32 %v2698_v39, %v2498_v30  ;;  %v2852_v42 = vadd.f32 %v4122_v0, %v2835_v52 }
 0x451   :  { %v2854_v61 = vadd.f32 %v4122_v0, %v2837_v23  ;;  %v2853_v51 = vadd.f32 %v4122_v0, %v2836_v56  ;;  %v2578_v34 = vmul.f32 1.442695, %v2557_v32  ;;  %v2689_v54 = vsel %vm4180_vm8, %v2686_v41, %v2683_v62 }
 0x452   :  { %v2855_v3 = vadd.f32 %v4122_v0, %v2838_v50  ;;  %v2770_v4 = vsel %vm2514_vm7, %v4065_v59, %v2754_v60  ;;  %v2701_v30 = vmul.f32 0.6931472, %v3560_v2  ;;  %v2843_v8 = vmul.f32 %v4103_v44, %v2768_v25 }
 0x453   :  { %v3195_v7 = vpack.c.bf16 %v2853_v51, %v2852_v42  ;;  %v2753_v9 = vadd.f32 %v2689_v54, %v2497_v57  ;;  %3565 = vpow2.f32 %v2578_v34  ;;  %v2543_v63 = vand.u32 2147483647, %v4215_v40 }
 0x454   :  { %v3196_v14 = vpack.c.bf16 %v2855_v3, %v2854_v61  ;;  %v2707_v19 = vsel %vm2706_vm10, %v2704_v29, %v2701_v30  ;;  %v2845_v59 = vmul.f32 %v4103_v44, %v2770_v4  ;;  %v2548_v36 = vand.u32 2147483647, %v4225_v49 }
 0x455   :  { %2916 = vst [vmem:[%s4396_s17] sm:$0xff] %v3195_v7  ;;  %v2769_v41 = vsel %vm2513_vm9, %v4076_v12, %v2753_v9  ;;  %v2755_v57 = vadd.f32 %v2707_v19, %v2499_v58  ;;  %v2559_v16 = vsub.f32 0.0, %v2543_v63  ;;  %v3562_v24 = vpop.eup %3561  ;;  %v2860_v12 = vadd.f32 %v4122_v0, %v2843_v8 }
 0x456   :  { %2917 = vst [vmem:[%s4396_s17 + $0x8] sm:$0xff] %v3196_v14  ;;  %v2844_v11 = vmul.f32 %v4103_v44, %v2769_v41  ;;  %v2636_v27 = vadd.f32 1.0, %v3562_v24  ;;  %v2862_v29 = vadd.f32 %v4122_v0, %v2845_v59  ;;  %v2564_v43 = vsub.f32 0.0, %v2548_v36 }
 0x457   :  { %v2771_v6 = vsel %vm2515_vm11, %v4078_v13, %v2755_v57  ;;  %v2582_v47 = vmul.f32 1.442695, %v2559_v16  ;;  %v4272_v13 = vadd.f32 %v2483_v20, %v4095_v35  ;;  %v4275_v31 = vadd.f32 %v2442_v5, %v4100_v22 }
 0x458   :  { %v2861_v18 = vadd.f32 %v4122_v0, %v2844_v11  ;;  %v2846_v58 = vmul.f32 %v4103_v44, %v2771_v6  ;;  %v3564_v45 = vpop.eup %3563  ;;  %3567 = vlog2.f32 %v2636_v27  ;;  %v4278_v38 = vadd.f32 %v2485_v28, %v4108_v26 }
 0x459   :  { %v2654_v17 = vadd.f32 1.0, %v3564_v45  ;;  %3569 = vpow2.f32 %v2582_v47  ;;  %v2592_v33 = vmul.f32 1.442695, %v2564_v43  ;;  %v2550_v35 = vand.u32 2147483647, %v4272_v13 }
 0x45a   :  { %v3199_v52 = vpack.c.bf16 %v2861_v18, %v2860_v12  ;;  %v2863_v37 = vadd.f32 %v4122_v0, %v2846_v58  ;;  %v2549_v22 = vand.u32 2147483647, %v4275_v31  ;;  %v2551_v53 = vand.u32 2147483647, %v4278_v38 }
 0x45b   :  { %3571 = vpow2.f32 %v2592_v33  ;;  %v2566_v26 = vsub.f32 0.0, %v2550_v35  ;;  %v2639_v32 = vmul.f32 -0.5, %v3562_v24  ;;  %v2642_v62 = vand.u32 2147483647, %v3562_v24 }
 0x45c   :  { %2920 = vst [vmem:[%s4396_s17 + $0x20] sm:$0xff] %v3199_v52  ;;  %v3200_v23 = vpack.c.bf16 %v2863_v37, %v2862_v29  ;;  %3573 = vlog2.f32 %v2654_v17  ;;  %v2565_v10 = vsub.f32 0.0, %v2549_v22  ;;  %v2567_v39 = vsub.f32 0.0, %v2551_v53 }
 0x45d   :  { %v2596_v56 = vmul.f32 1.442695, %v2566_v26  ;;  %v2640_v25 = vadd.f32 1.0, %v2639_v32  ;;  %v2657_v51 = vmul.f32 -0.5, %v3564_v45  ;;  %vm2643_vm12 = vcmp.lt.f32.partialorder %v2642_v62, 0.0004427343 }
 0x45e   :  { %2921 = vst [vmem:[%s4396_s17 + $0x28] sm:$0xff] %v3200_v23  ;;  %v2594_v48 = vmul.f32 1.442695, %v2565_v10  ;;  %v2598_v50 = vmul.f32 1.442695, %v2567_v39  ;;  %v2492_v8 = vmax.f32 %v4129_v15, 0.0  ;;  %vm2509_vm0 = vcmp.ne.f32.partialorder %v4165_v1, %v4165_v1 }
 0x45f   :  { %v2641_v61 = vmul.f32 %v3562_v24, %v2640_v25  ;;  %v2660_v9 = vand.u32 2147483647, %v3564_v45  ;;  %v2658_v14 = vadd.f32 1.0, %v2657_v51  ;;  %v2493_v11 = vmax.f32 %v4165_v1, 0.0 }
 0x460   :  { %v3566_v46 = vpop.eup %3565  ;;  %v2494_v43 = vmax.f32 %v4136_v21, 0.0  ;;  %vm2510_vm1 = vcmp.ne.f32.partialorder %v4136_v21, %v4136_v21  ;;  %vm2511_vm4 = vcmp.ne.f32.partialorder %v4215_v40, %v4215_v40  ;;  %vm2516_vm5 = vcmp.ne.f32.partialorder %v4225_v49, %v4225_v49 }
 0x461   :  { %v2645_v55 = vadd.f32 1.0, %v3566_v46  ;;  %v2648_v34 = vmul.f32 -0.5, %v3566_v46  ;;  %v2651_v20 = vand.u32 2147483647, %v3566_v46  ;;  %vm4295_vm14 = vcmp.lt.f32.partialorder %v2660_v9, 0.0004427343 }
 0x462   :  { %v2659_v36 = vmul.f32 %v3564_v45, %v2658_v14  ;;  %vm2518_vm8 = vcmp.ne.f32.partialorder %v4272_v13, %v4272_v13  ;;  %vm2517_vm10 = vcmp.ne.f32.partialorder %v4275_v31, %v4275_v31  ;;  %vm2519_vm11 = vcmp.ne.f32.partialorder %v4278_v38, %v4278_v38 }
 0x463   :  { %3575 = vlog2.f32 %v2645_v55  ;;  %v2649_v19 = vadd.f32 1.0, %v2648_v34  ;;  %vm2652_vm15 = vcmp.lt.f32.partialorder %v2651_v20, 0.0004427343 }
 0x464   :  { %3577 = vpow2.f32 %v2596_v56 }
 0x465   :  { %3579 = vpow2.f32 %v2594_v48  ;;  %v3568_v60 = vpop.eup %3567  ;;  %v2650_v6 = vmul.f32 %v3566_v46, %v2649_v19  ;;  %v2495_v46 = vmax.f32 %v4215_v40, 0.0 }
 0x466   :  { %3581 = vpow2.f32 %v2598_v50  ;;  %v2638_v2 = vmul.f32 0.6931472, %v3568_v60  ;;  %v3570_v42 = vpop.eup %3569 }
 0x467   :  { %v2663_v3 = vadd.f32 1.0, %v3570_v42  ;;  %v2666_v12 = vmul.f32 -0.5, %v3570_v42  ;;  %v2669_v35 = vand.u32 2147483647, %v3570_v42 }
 0x468   :  { %v4289_v4 = vpop.eup %3571  ;;  %v2644_v54 = vsel %vm2643_vm12, %v2641_v61, %v2638_v2 }
 0x469   :  { %3583 = vlog2.f32 %v2663_v3  ;;  %v2708_v30 = vadd.f32 1.0, %v4289_v4  ;;  %v3574_v7 = vpop.eup %3573  ;;  %v2748_v63 = vadd.f32 %v2644_v54, %v2492_v8  ;;  %v2711_v27 = vmul.f32 -0.5, %v4289_v4 }
 0x46a   :  { %v2656_v59 = vmul.f32 0.6931472, %v3574_v7  ;;  %v2667_v37 = vadd.f32 1.0, %v2666_v12  ;;  %v2714_v10 = vand.u32 2147483647, %v4289_v4 }
 0x46b   :  { %3585 = vlog2.f32 %v2708_v30  ;;  %v2764_v58 = vsel %vm2508_vm13, %v4129_v15, %v2748_v63  ;;  %v2712_v22 = vadd.f32 1.0, %v2711_v27  ;;  %vm2670_vm2 = vcmp.lt.f32.partialorder %v2669_v35, 0.0004427343 }
 0x46c   :  { %v2662_v29 = vsel %vm4295_vm14, %v2659_v36, %v2656_v59  ;;  %v2839_v15 = vmul.f32 %v4103_v44, %v2764_v58  ;;  %v2668_v48 = vmul.f32 %v3570_v42, %v2667_v37  ;;  %vm2715_vm3 = vcmp.lt.f32.partialorder %v2714_v10, 0.0004427343 }
 0x46d   :  { %v2750_v17 = vadd.f32 %v2662_v29, %v2494_v43  ;;  %v2713_v50 = vmul.f32 %v4289_v4, %v2712_v22  ;;  %v2500_v4 = vmax.f32 %v4225_v49, 0.0  ;;  %v2501_v29 = vmax.f32 %v4275_v31, 0.0 }
 0x46e   :  { %v2856_v32 = vadd.f32 %v4122_v0, %v2839_v15 }
 0x46f   :  { %v2766_v39 = vsel %vm2510_vm1, %v4136_v21, %v2750_v17 }
 0x470   :  { %v3576_v41 = vpop.eup %3575  ;;  %v2841_v34 = vmul.f32 %v4103_v44, %v2766_v39 }
 0x471   :  { %v4300_v16 = vpop.eup %3577  ;;  %v2647_v24 = vmul.f32 0.6931472, %v3576_v41  ;;  %v2502_v41 = vmax.f32 %v4272_v13, 0.0 }
 0x472   :  { %v4302_v18 = vpop.eup %3579  ;;  %v2726_v5 = vadd.f32 1.0, %v4300_v16  ;;  %v2729_v25 = vmul.f32 -0.5, %v4300_v16  ;;  %v2732_v7 = vand.u32 2147483647, %v4300_v16  ;;  %v2858_v63 = vadd.f32 %v4122_v0, %v2841_v34 }
 0x473   :  { %v4307_v28 = vpop.eup %3581  ;;  %v2653_v47 = vsel %vm2652_vm15, %v2650_v6, %v2647_v24  ;;  %v2717_v45 = vadd.f32 1.0, %v4302_v18  ;;  %v2720_v61 = vmul.f32 -0.5, %v4302_v18  ;;  %v2723_v14 = vand.u32 2147483647, %v4302_v18 }
 0x474   :  { %v2749_v52 = vadd.f32 %v2653_v47, %v2493_v11  ;;  %3587 = vlog2.f32 %v2726_v5  ;;  %v2735_v23 = vadd.f32 1.0, %v4307_v28  ;;  %v2738_v42 = vmul.f32 -0.5, %v4307_v28 }
 0x475   :  { %3589 = vlog2.f32 %v2717_v45  ;;  %v2730_v54 = vadd.f32 1.0, %v2729_v25  ;;  %v2721_v8 = vadd.f32 1.0, %v2720_v61  ;;  %v2741_v36 = vand.u32 2147483647, %v4307_v28 }
 0x476   :  { %v2765_v33 = vsel %vm2509_vm0, %v4165_v1, %v2749_v52  ;;  %3591 = vlog2.f32 %v2735_v23  ;;  %v3584_v53 = vpop.eup %3583  ;;  %vm2733_vm6 = vcmp.lt.f32.partialorder %v2732_v7, 0.0004427343  ;;  %vm2724_vm7 = vcmp.lt.f32.partialorder %v2723_v14, 0.0004427343 }
 0x477   :  { %v2840_v26 = vmul.f32 %v4103_v44, %v2765_v33  ;;  %v2665_v56 = vmul.f32 0.6931472, %v3584_v53  ;;  %v2731_v11 = vmul.f32 %v4300_v16, %v2730_v54  ;;  %v2722_v12 = vmul.f32 %v4302_v18, %v2721_v8 }
 0x478   :  { %v3586_v1 = vpop.eup %3585  ;;  %v2503_v52 = vmax.f32 %v4278_v38, 0.0  ;;  %vm2742_vm9 = vcmp.lt.f32.partialorder %v2741_v36, 0.0004427343 }
 0x479   :  { %v2857_v55 = vadd.f32 %v4122_v0, %v2840_v26  ;;  %v2671_v62 = vsel %vm2670_vm2, %v2668_v48, %v2665_v56  ;;  %v2710_v2 = vmul.f32 0.6931472, %v3586_v1 }
 0x47a   :  { %v2751_v51 = vadd.f32 %v2671_v62, %v2495_v46 }
 0x47b   :  { %v3197_v60 = vpack.c.bf16 %v2857_v55, %v2856_v32  ;;  %v2716_v21 = vsel %vm2715_vm3, %v2713_v50, %v2710_v2 }
 0x47c   :  { %v2767_v3 = vsel %vm2511_vm4, %v4215_v40, %v2751_v51  ;;  %v2756_v9 = vadd.f32 %v2716_v21, %v2500_v4  ;;  %v2739_v40 = vadd.f32 1.0, %v2738_v42 }
 0x47d   :  { %2918 = vst [vmem:[%s4396_s17 + $0x10] sm:$0xff] %v3197_v60  ;;  %v2842_v30 = vmul.f32 %v4103_v44, %v2767_v3 }
 0x47e   :  { %v2772_v27 = vsel %vm2516_vm5, %v4225_v49, %v2756_v9  ;;  %v2740_v43 = vmul.f32 %v4307_v28, %v2739_v40 }
 0x47f   :  { %v2859_v20 = vadd.f32 %v4122_v0, %v2842_v30  ;;  %v2847_v49 = vmul.f32 %v4103_v44, %v2772_v27 }
 0x481   :  { %v3588_v19 = vpop.eup %3587  ;;  %v3198_v24 = vpack.c.bf16 %v2859_v20, %v2858_v63  ;;  %v2864_v22 = vadd.f32 %v4122_v0, %v2847_v49 }
 0x482   :  { %v3590_v59 = vpop.eup %3589  ;;  %v2728_v57 = vmul.f32 0.6931472, %v3588_v19 }
 0x483   :  { %v2719_v6 = vmul.f32 0.6931472, %v3590_v59  ;;  %v3592_v58 = vpop.eup %3591  ;;  %2919 = vst [vmem:[%s4396_s17 + $0x18] sm:$0xff] %v3198_v24 }
 0x484   :  { %v2734_v5 = vsel %vm2733_vm6, %v2731_v11, %v2728_v57  ;;  %v2737_v45 = vmul.f32 0.6931472, %v3592_v58 }
 0x485   :  { %v2758_v47 = vadd.f32 %v2734_v5, %v2502_v41  ;;  %v2725_v16 = vsel %vm2724_vm7, %v2722_v12, %v2719_v6 }
 0x486   :  { %v2757_v18 = vadd.f32 %v2725_v16, %v2501_v29  ;;  %v2743_v37 = vsel %vm2742_vm9, %v2740_v43, %v2737_v45 }
 0x487   :  { %v2774_v15 = vsel %vm2518_vm8, %v4272_v13, %v2758_v47  ;;  %v2759_v17 = vadd.f32 %v2743_v37, %v2503_v52 }
 0x488   :  { %v2773_v23 = vsel %vm2517_vm10, %v4275_v31, %v2757_v18  ;;  %v2849_v28 = vmul.f32 %v4103_v44, %v2774_v15 }
 0x489   :  { %v2848_v33 = vmul.f32 %v4103_v44, %v2773_v23  ;;  %v2775_v35 = vsel %vm2519_vm11, %v4278_v38, %v2759_v17 }
 0x48a   :  { %v2850_v26 = vmul.f32 %v4103_v44, %v2775_v35  ;;  %v2866_v53 = vadd.f32 %v4122_v0, %v2849_v28 }
 0x48b   :  { %v2865_v13 = vadd.f32 %v4122_v0, %v2848_v33 }
 0x48c   :  { %v2867_v31 = vadd.f32 %v4122_v0, %v2850_v26 }
 0x48d   :  { %v3201_v46 = vpack.c.bf16 %v2865_v13, %v2864_v22 }
 0x48e   :  { %v3202_v10 = vpack.c.bf16 %v2867_v31, %v2866_v53 }
 0x48f   :  { %2922 = vst [vmem:[%s4396_s17 + $0x30] sm:$0xff] %v3201_v46 }
 0x490   :  { %2923 = vst [vmem:[%s4396_s17 + $0x38] sm:$0xff] %v3202_v10 }
 0x491   :  { %2936 = vsyncpa [#allocation3], 1 }
 0x492   :  { %2937 = vsyncpa [#allocation7], 1 }
 0x493   :  { %2938 = vsyncpa [#allocation4], 1 }

</bundles_post_ra>
